<compile_context>
chip_gen: v5e
topology: v5e:2x2
jax: 0.10.0
libtpu: 0.0.40
codegen_flags: <defaults>
</compile_context>

<pallas_src>
import functools

import jax
import jax.numpy as jnp
import numpy as np
from jax import lax
from jax.experimental import pallas as pl
from jax.experimental.pallas import tpu as pltpu

HIDDEN = 64
LANES = 128
SUBLANES = 8

_CORE_PARALLEL = getattr(pltpu, "CORE_PARALLEL", "parallel")


def _round_up(x, m):
    return (x + m - 1) // m * m


def _choose_fold(d, hidden, lanes=LANES):
    """Pick how many batch rows to fold per lane-row.

    Chosen so fold*hidden is a multiple of 128 (full vregs for tanh / bias-add) and
    fold*d fills the lane width / MXU K dim, while keeping the replicated weight
    blocks small.  For the module's hidden=64 and state_dim=32 this returns 4.
    """
    fold = 1
    for f in (2, 4, 8):
        if (f * hidden) % lanes != 0:
            continue
        if f * d > 1024 or f * hidden > 1024:
            break
        fold = f
        if f * d >= lanes:
            break
    return fold


def _on_v7():
    """True iff the default backend is a v7x-class TPU (2 TensorCores per chip)."""
    try:
        kind = jax.devices()[0].device_kind.lower()
    except Exception:
        return False
    return ("v7" in kind) or ("ironwood" in kind)


# --------------------------------------------------------------------------- kernel


def _valuenet_kernel(x_ref, p_ref, o_ref):
    """One folded batch tile through the packed block-diagonal 3-layer MLP.

    x_ref: (TBf, DF)    folded states, DF = fold * state_dim (f32 or bf16)
    p_ref: (R, C)       packed weight slab, C = fold * 64 lanes (resident across tiles)
    o_ref: (TBf, fold)  per-fold values, f32
    """
    f32 = jnp.float32
    df = x_ref.shape[1]
    c = p_ref.shape[1]
    fold = o_ref.shape[1]
    df_pad = _round_up(df, SUBLANES)
    r0 = df_pad + c  # first bias row

    x = x_ref[...]                                  # (TBf, DF)
    w1 = p_ref[0:df, :]                             # (DF, C)  block-diag layer 1
    w2 = p_ref[df_pad:r0, :]                        # (C, C)   block-diag layer 2
    b1 = p_ref[r0:r0 + 1, :].astype(f32)            # (1, C)   tiled bias 1
    b2 = p_ref[r0 + 1:r0 + 2, :].astype(f32)        # (1, C)   tiled bias 2
    w3 = p_ref[r0 + 2:r0 + 2 + fold, :]             # (fold, C) block-diag 64->1 rows

    # MXU matmuls with f32 accumulation; bias-add / tanh stay f32 (v5e has no bf16
    # VPU/EUP).  When the slab / x are bf16 the MXU inputs are bf16 (v6e/v7x option).
    h1 = jnp.tanh(jnp.dot(x, w1, preferred_element_type=f32) + b1)    # (TBf, C)
    h1 = h1.astype(w2.dtype)
    h2 = jnp.tanh(jnp.dot(h1, w2, preferred_element_type=f32) + b2)   # (TBf, C)
    h2 = h2.astype(w3.dtype)

    # Final projection: contract the lane dim of h2 against each fold's w3 row.
    v = lax.dot_general(h2, w3, (((1,), (1,)), ((), ())),
                        preferred_element_type=f32)                   # (TBf, fold)
    o_ref[...] = v.astype(o_ref.dtype)


# ----------------------------------------------------------------- parameter packing


def pack_params(w1, b1, w2, b2, w3, *, fold=None, dtype=jnp.float32):
    """Pack all ValueNet parameters into one lane-aligned block-diagonal slab.

    With C = round_up(fold*64, 128) lanes:
      rows [0, fold*D)            : fold diagonal copies of w1  (D, 64)
      rows [DF_pad, DF_pad + C)   : fold diagonal copies of w2  (64, 64)
      row  DF_pad + C             : b1 tiled fold times
      row  DF_pad + C + 1         : b2 tiled fold times
      rows DF_pad + C + 2 + f     : w3 placed in segment f (block-diag 64->1 rows)
    Zero-padded hidden columns act as dead units (bias 0 -> tanh(0) = 0 -> no effect),
    so the kernel always loads full-width, unmasked weight tiles.
    """
    w1 = np.asarray(w1, np.float32)
    w2 = np.asarray(w2, np.float32)
    b1 = np.asarray(b1, np.float32).reshape(-1)
    b2 = np.asarray(b2, np.float32).reshape(-1)
    w3 = np.asarray(w3, np.float32).reshape(-1)
    d, h = w1.shape
    if fold is None:
        fold = _choose_fold(d, h)
    df = fold * d
    hf = fold * h
    c = _round_up(hf, LANES)
    df_pad = _round_up(df, SUBLANES)
    rows = _round_up(df_pad + c + 2 + fold, SUBLANES)

    slab = np.zeros((rows, c), np.float32)
    for f in range(fold):
        cs = f * h
        slab[f * d:(f + 1) * d, cs:cs + h] = w1
        slab[df_pad + f * h:df_pad + (f + 1) * h, cs:cs + h] = w2
        slab[df_pad + c, cs:cs + h] = b1
        slab[df_pad + c + 1, cs:cs + h] = b2
        slab[df_pad + c + 2 + f, cs:cs + h] = w3
    return jnp.asarray(slab, dtype=dtype)


# ------------------------------------------------------------------------ forward


def _mlp_call(xf, slab, num_tiles, block_bf, fold, core_parallel):
    """pallas_call over `num_tiles` full (block_bf, DF) tiles of the folded input."""
    df = xf.shape[1]
    c = slab.shape[1]
    out_rows = num_tiles * block_bf
    itemsize = slab.dtype.itemsize
    cost = pl.CostEstimate(
        flops=2 * out_rows * (df * c + c * c + c * fold),
        transcendentals=2 * out_rows * c,
        bytes_accessed=(out_rows * df + int(slab.size)) * itemsize + out_rows * fold * 4,
    )
    if core_parallel and num_tiles >= 2:
        sem = (_CORE_PARALLEL,)           # v7x: split batch tiles over both TCs
    else:
        sem = ("parallel",)
    return pl.pallas_call(
        _valuenet_kernel,
        out_shape=jax.ShapeDtypeStruct((out_rows, fold), jnp.float32),
        grid=(num_tiles,),
        in_specs=[
            pl.BlockSpec((block_bf, df), lambda i: (i, 0)),   # folded batch tile
            pl.BlockSpec(slab.shape, lambda i: (0, 0)),       # weights stay resident
        ],
        out_specs=pl.BlockSpec((block_bf, fold), lambda i: (i, 0)),
        compiler_params=pltpu.CompilerParams(dimension_semantics=sem),
        cost_estimate=cost,
    )(xf, slab)


@functools.partial(jax.jit, static_argnames=("fold", "block_rows", "core_parallel"))
def _valuenet_pallas(x, param_slab, *, fold, block_rows, core_parallel):
    bsz, d = x.shape
    pad = (-bsz) % fold
    if pad:
        # Rare (only when B % fold != 0); copies x once.  Prefer fold-aligned batches.
        x = jnp.concatenate([x, jnp.zeros((pad, d), x.dtype)], axis=0)
    bf = (bsz + pad) // fold
    xf = x.reshape(bf, fold * d)                  # row-major fold: layout-free reshape
    if xf.dtype != param_slab.dtype:
        xf = xf.astype(param_slab.dtype)          # bf16 slab => bf16 x DMA (v6e/v7x)

    block_bf = min(bf, block_rows)
    n_main = bf // block_bf
    rem = bf - n_main * block_bf

    outs = []
    if n_main:
        # Gridded call over the full tiles only (no padding, no partial blocks).
        outs.append(_mlp_call(xf, param_slab, n_main, block_bf, fold, core_parallel))
    if rem:
        # Ragged tail: one single-tile call whose block equals the tail shape.
        outs.append(_mlp_call(xf[n_main * block_bf:], param_slab, 1, rem, fold,
                              core_parallel))
    out = outs[0] if len(outs) == 1 else jnp.concatenate(outs, axis=0)
    # out[r, f] is the value of batch row r*fold + f -> row-major flatten restores order.
    return out.reshape(-1)[:bsz]


@functools.partial(jax.jit, static_argnames=("hidden", "fold"))
def _valuenet_small(x, slab, *, hidden, fold):
    """Tiny-batch path: plain fused jnp (dispatch-overhead bound; Pallas not worth it)."""
    d = x.shape[1]
    c = slab.shape[1]
    df_pad = _round_up(fold * d, SUBLANES)
    f32 = jnp.float32
    hi = lax.Precision.HIGHEST
    w1 = slab[0:d, 0:hidden].astype(f32)
    w2 = slab[df_pad:df_pad + hidden, 0:hidden].astype(f32)
    b1 = slab[df_pad + c, 0:hidden].astype(f32)
    b2 = slab[df_pad + c + 1, 0:hidden].astype(f32)
    w3 = slab[df_pad + c + 2, 0:hidden].astype(f32)
    h1 = jnp.tanh(jnp.dot(x.astype(f32), w1, precision=hi) + b1)
    h2 = jnp.tanh(jnp.dot(h1, w2, precision=hi) + b2)
    return jnp.dot(h2, w3, precision=hi)          # (B,), matches .squeeze(-1)


def valuenet_forward(x, param_slab, *, hidden=HIDDEN, fold=None, block_rows=2048,
                     min_pallas_batch=256, force_pallas=False):
    """x: (B, state_dim) f32; param_slab from pack_params -> (B,) f32 values.

    Numerics follow the slab dtype: f32 slab = exact path (1e-5 parity), bf16 slab =
    bf16 MXU inputs / bf16 x DMA with f32 accumulation (~1e-2 parity, v6e/v7x perf).
    `block_rows` is the folded-rows tile (2048 folded rows == 8192 batch rows for
    state_dim=32); keep it a multiple of 128.
    """
    bsz, d = x.shape
    if fold is None:
        fold = _choose_fold(d, hidden)
    if not force_pallas and bsz < min_pallas_batch:
        return _valuenet_small(x, param_slab, hidden=hidden, fold=fold)
    block_rows = max(LANES, (int(block_rows) // LANES) * LANES)
    return _valuenet_pallas(x, param_slab, fold=fold, block_rows=block_rows,
                            core_parallel=_on_v7())


# -------------------------------------------------------------------- init helpers


def orthogonal_init(key, shape, gain):
    """Deterministic orthogonal init (same semantics as nn.init.orthogonal_)."""
    rows, cols = shape
    flat = jax.random.normal(key, (max(rows, cols), min(rows, cols)), dtype=jnp.float32)
    q, r = jnp.linalg.qr(flat)
    q = q * jnp.sign(jnp.diagonal(r))
    if rows < cols:
        q = q.T
    return gain * q[:rows, :cols]


def init_params(key, state_dim, hidden=HIDDEN):
    k1, k2, k3 = jax.random.split(key, 3)
    gain = np.sqrt(2.0)
    # PyTorch Linear weight is (out, in); store transposed (in, out) for x @ W.
    w1 = orthogonal_init(k1, (hidden, state_dim), gain).T        # (D, 64)
    b1 = jnp.zeros((hidden,), jnp.float32)
    w2 = orthogonal_init(k2, (hidden, hidden), gain).T           # (64, 64)
    b2 = jnp.zeros((hidden,), jnp.float32)
    w3 = orthogonal_init(k3, (1, hidden), gain).T                # (64, 1), no bias
    return w1, b1, w2, b2, w3


if __name__ == "__main__":
    key = jax.random.PRNGKey(0)
    kx1, kx2, kp = jax.random.split(key, 3)

    state_dim = 32
    w1, b1, w2, b2, w3 = init_params(kp, state_dim)

    # Pack once (outside the hot path); reuse the slab for every forward call.
    slab_f32 = jax.block_until_ready(pack_params(w1, b1, w2, b2, w3))
    slab_bf16 = jax.block_until_ready(pack_params(w1, b1, w2, b2, w3, dtype=jnp.bfloat16))

    w1_64, w2_64 = np.asarray(w1, np.float64), np.asarray(w2, np.float64)
    b1_64, b2_64 = np.asarray(b1, np.float64), np.asarray(b2, np.float64)
    w3_64 = np.asarray(w3, np.float64)

    def ref_values(xa):
        xd = np.asarray(xa, np.float64)
        h1 = np.tanh(xd @ w1_64 + b1_64)
        h2 = np.tanh(h1 @ w2_64 + b2_64)
        return (h2 @ w3_64)[:, 0]

    # 1) Pallas path, f32: multi-tile grid (128-folded-row tiles) plus a ragged tail
    #    handled by a second full-block call (B=1700, fold=4 -> 3 tiles + 41-row tail).
    B1 = 1700
    x1 = jax.random.normal(kx1, (B1, state_dim), dtype=jnp.float32)
    v1 = jax.block_until_ready(
        valuenet_forward(x1, slab_f32, block_rows=128, force_pallas=True))
    assert v1.shape == (B1,)
    np.testing.assert_allclose(np.asarray(v1), ref_values(x1), rtol=5e-5, atol=5e-5)

    # 2) bf16 MXU-input path (v6e/v7x perf option): single folded tile, looser tolerance.
    v1b = jax.block_until_ready(
        valuenet_forward(x1[:512], slab_bf16, force_pallas=True))
    np.testing.assert_allclose(np.asarray(v1b), ref_values(x1[:512]),
                               rtol=5e-2, atol=5e-2)

    # 3) Tiny batch (per-step PPO inference, B=8): dispatcher skips Pallas entirely.
    x2 = jax.random.normal(kx2, (8, state_dim), dtype=jnp.float32)
    v2 = jax.block_until_ready(valuenet_forward(x2, slab_f32))
    assert v2.shape == (8,)
    np.testing.assert_allclose(np.asarray(v2), ref_values(x2), rtol=5e-5, atol=5e-5)

    print("KERNEL_OK")
</pallas_src>

<mosaic_0001>
module attributes {stable_mosaic.version = 11 : i64} {
  func.func @_valuenet_kernel(%arg0: i32, %arg1: memref<128x128xf32, #tpu.memory_space<vmem>>, %arg2: memref<392x256xf32, #tpu.memory_space<vmem>>, %arg3: memref<128x4xf32, #tpu.memory_space<vmem>>) attributes {dimension_semantics = [#tpu.dimension_semantics<parallel>], iteration_bounds = array<i64: 3>, scalar_prefetch = 0 : i64, scratch_operands = 0 : i64, tpu.core_type = #tpu.core_type<tc>, window_params = [{transform_indices = @transform_0, window_bounds = array<i64: 128, 128>}, {pipeline_mode = #tpu.pipeline_mode<synchronous>, transform_indices = @transform_1, window_bounds = array<i64: 392, 256>}, {transform_indices = @transform_2, window_bounds = array<i64: 128, 4>}]} {
    %c0 = arith.constant 0 : index
    %c0_0 = arith.constant 0 : index
    %0 = vector.load %arg1[%c0, %c0_0] : memref<128x128xf32, #tpu.memory_space<vmem>>, vector<128x128xf32>
    %c0_1 = arith.constant 0 : index
    %c0_2 = arith.constant 0 : index
    %1 = vector.load %arg2[%c0_1, %c0_2] : memref<392x256xf32, #tpu.memory_space<vmem>>, vector<128x256xf32>
    %c128 = arith.constant 128 : index
    %c0_3 = arith.constant 0 : index
    %2 = vector.load %arg2[%c128, %c0_3] : memref<392x256xf32, #tpu.memory_space<vmem>>, vector<256x256xf32>
    %c384 = arith.constant 384 : index
    %c0_4 = arith.constant 0 : index
    %3 = vector.load %arg2[%c384, %c0_4] : memref<392x256xf32, #tpu.memory_space<vmem>>, vector<1x256xf32>
    %c385 = arith.constant 385 : index
    %c0_5 = arith.constant 0 : index
    %4 = vector.load %arg2[%c385, %c0_5] : memref<392x256xf32, #tpu.memory_space<vmem>>, vector<1x256xf32>
    %c386 = arith.constant 386 : index
    %c0_6 = arith.constant 0 : index
    %5 = vector.load %arg2[%c386, %c0_6] : memref<392x256xf32, #tpu.memory_space<vmem>>, vector<4x256xf32>
    %cst = arith.constant dense<0.000000e+00> : vector<128x256xf32>
    %6 = tpu.matmul %0, %1, %cst {dimension_numbers = #tpu.dot_dimension_numbers<[1], [0], [0], [1], [0, 0, 1, 1], [], []>} : vector<128x128xf32>, vector<128x256xf32>, vector<128x256xf32> -> vector<128x256xf32>
    %7 = vector.broadcast %3 : vector<1x256xf32> to vector<128x256xf32>
    %8 = arith.addf %6, %7 : vector<128x256xf32>
    %9 = math.tanh %8 : vector<128x256xf32>
    %cst_7 = arith.constant dense<0.000000e+00> : vector<128x256xf32>
    %10 = tpu.matmul %9, %2, %cst_7 {dimension_numbers = #tpu.dot_dimension_numbers<[1], [0], [0], [1], [0, 0, 1, 1], [], []>} : vector<128x256xf32>, vector<256x256xf32>, vector<128x256xf32> -> vector<128x256xf32>
    %11 = vector.broadcast %4 : vector<1x256xf32> to vector<128x256xf32>
    %12 = arith.addf %10, %11 : vector<128x256xf32>
    %13 = math.tanh %12 : vector<128x256xf32>
    %cst_8 = arith.constant dense<0.000000e+00> : vector<128x4xf32>
    %14 = tpu.matmul %13, %5, %cst_8 {dimension_numbers = #tpu.dot_dimension_numbers<[1], [1], [0], [0], [0, 0, 1, 0], [], []>} : vector<128x256xf32>, vector<4x256xf32>, vector<128x4xf32> -> vector<128x4xf32>
    %c0_9 = arith.constant 0 : index
    %c0_10 = arith.constant 0 : index
    %15 = vector.load %arg3[%c0_9, %c0_10] : memref<128x4xf32, #tpu.memory_space<vmem>>, vector<128x4xf32>
    tpu.vector_store %arg3[%c0_9, %c0_10], %14 {strides = array<i32>} : memref<128x4xf32, #tpu.memory_space<vmem>>, vector<128x4xf32>,
    return
  }
  func.func @transform_0(%arg0: i32) -> (i32, i32) {
    %c0_i32 = arith.constant 0 : i32
    %c0_i32_0 = arith.constant 0 : i32
    return %arg0, %c0_i32 : i32, i32
  }
  func.func @transform_1(%arg0: i32) -> (i32, i32) {
    %c0_i32 = arith.constant 0 : i32
    %c0_i32_0 = arith.constant 0 : i32
    %c0_i32_1 = arith.constant 0 : i32
    return %c0_i32, %c0_i32_0 : i32, i32
  }
  func.func @transform_2(%arg0: i32) -> (i32, i32) {
    %c0_i32 = arith.constant 0 : i32
    %c0_i32_0 = arith.constant 0 : i32
    return %arg0, %c0_i32 : i32, i32
  }
}

module attributes {stable_mosaic.version = 11 : i64} {
  func.func @_valuenet_kernel(%arg0: i32, %arg1: memref<41x128xf32, #tpu.memory_space<vmem>>, %arg2: memref<392x256xf32, #tpu.memory_space<vmem>>, %arg3: memref<41x4xf32, #tpu.memory_space<vmem>>) attributes {dimension_semantics = [#tpu.dimension_semantics<parallel>], iteration_bounds = array<i64: 1>, scalar_prefetch = 0 : i64, scratch_operands = 0 : i64, tpu.core_type = #tpu.core_type<tc>, window_params = [{transform_indices = @transform_0, window_bounds = array<i64: 41, 128>}, {pipeline_mode = #tpu.pipeline_mode<synchronous>, transform_indices = @transform_1, window_bounds = array<i64: 392, 256>}, {transform_indices = @transform_2, window_bounds = array<i64: 41, 4>}]} {
    %c0 = arith.constant 0 : index
    %c0_0 = arith.constant 0 : index
    %0 = vector.load %arg1[%c0, %c0_0] : memref<41x128xf32, #tpu.memory_space<vmem>>, vector<41x128xf32>
    %c0_1 = arith.constant 0 : index
    %c0_2 = arith.constant 0 : index
    %1 = vector.load %arg2[%c0_1, %c0_2] : memref<392x256xf32, #tpu.memory_space<vmem>>, vector<128x256xf32>
    %c128 = arith.constant 128 : index
    %c0_3 = arith.constant 0 : index
    %2 = vector.load %arg2[%c128, %c0_3] : memref<392x256xf32, #tpu.memory_space<vmem>>, vector<256x256xf32>
    %c384 = arith.constant 384 : index
    %c0_4 = arith.constant 0 : index
    %3 = vector.load %arg2[%c384, %c0_4] : memref<392x256xf32, #tpu.memory_space<vmem>>, vector<1x256xf32>
    %c385 = arith.constant 385 : index
    %c0_5 = arith.constant 0 : index
    %4 = vector.load %arg2[%c385, %c0_5] : memref<392x256xf32, #tpu.memory_space<vmem>>, vector<1x256xf32>
    %c386 = arith.constant 386 : index
    %c0_6 = arith.constant 0 : index
    %5 = vector.load %arg2[%c386, %c0_6] : memref<392x256xf32, #tpu.memory_space<vmem>>, vector<4x256xf32>
    %cst = arith.constant dense<0.000000e+00> : vector<41x256xf32>
    %6 = tpu.matmul %0, %1, %cst {dimension_numbers = #tpu.dot_dimension_numbers<[1], [0], [0], [1], [0, 0, 1, 1], [], []>} : vector<41x128xf32>, vector<128x256xf32>, vector<41x256xf32> -> vector<41x256xf32>
    %7 = vector.broadcast %3 : vector<1x256xf32> to vector<41x256xf32>
    %8 = arith.addf %6, %7 : vector<41x256xf32>
    %9 = math.tanh %8 : vector<41x256xf32>
    %cst_7 = arith.constant dense<0.000000e+00> : vector<41x256xf32>
    %10 = tpu.matmul %9, %2, %cst_7 {dimension_numbers = #tpu.dot_dimension_numbers<[1], [0], [0], [1], [0, 0, 1, 1], [], []>} : vector<41x256xf32>, vector<256x256xf32>, vector<41x256xf32> -> vector<41x256xf32>
    %11 = vector.broadcast %4 : vector<1x256xf32> to vector<41x256xf32>
    %12 = arith.addf %10, %11 : vector<41x256xf32>
    %13 = math.tanh %12 : vector<41x256xf32>
    %cst_8 = arith.constant dense<0.000000e+00> : vector<41x4xf32>
    %14 = tpu.matmul %13, %5, %cst_8 {dimension_numbers = #tpu.dot_dimension_numbers<[1], [1], [0], [0], [0, 0, 1, 0], [], []>} : vector<41x256xf32>, vector<4x256xf32>, vector<41x4xf32> -> vector<41x4xf32>
    %c0_9 = arith.constant 0 : index
    %c0_10 = arith.constant 0 : index
    %15 = vector.load %arg3[%c0_9, %c0_10] : memref<41x4xf32, #tpu.memory_space<vmem>>, vector<41x4xf32>
    tpu.vector_store %arg3[%c0_9, %c0_10], %14 {strides = array<i32>} : memref<41x4xf32, #tpu.memory_space<vmem>>, vector<41x4xf32>,
    return
  }
  func.func @transform_0(%arg0: i32) -> (i32, i32) {
    %c0_i32 = arith.constant 0 : i32
    %c0_i32_0 = arith.constant 0 : i32
    return %arg0, %c0_i32 : i32, i32
  }
  func.func @transform_1(%arg0: i32) -> (i32, i32) {
    %c0_i32 = arith.constant 0 : i32
    %c0_i32_0 = arith.constant 0 : i32
    %c0_i32_1 = arith.constant 0 : i32
    return %c0_i32, %c0_i32_0 : i32, i32
  }
  func.func @transform_2(%arg0: i32) -> (i32, i32) {
    %c0_i32 = arith.constant 0 : i32
    %c0_i32_0 = arith.constant 0 : i32
    return %arg0, %c0_i32 : i32, i32
  }
}

</mosaic_0001>

<bundles_post_ra>
// kernel: _valuenet_pallas.2
= control target key start
LH: loop header
LB: loop body
LE: loop exit
PB: predicated region body
PF: predicated region fallthrough
CT: control target
= control target key end

     0   :  { %s1130_s9 = smov 0   ;;  %s1579_s0 = inlined_call_operand.vmem [shape: f32[425,128], index: 0, kind: input, shape index: {}]   ;;  %s1580_s1 = inlined_call_operand.vmem [shape: f32[392,256], index: 1, kind: input, shape index: {}]   ;;  %s1581_s2 = inlined_call_operand.vmem [shape: f32[384,4], index: 2, kind: output, shape index: {}]  }
   0x1 LB: > { %s958_s10 = sadd.s32 4294967295, %s1113_s9   ;;  %p962_p0 = scmp.ge.s32.totalorder %s1113_s9, 1  ;;  %s1113_s9 = sphi %s1130_s9, %s12_s9  }
   0x2   : > { %p121_p1 = scmp.lt.s32.totalorder %s1113_s9, 4 }
   0x4   : > { %p122_p2 = pnand %p962_p0, %p121_p1 }
   0x5   : > { %s1188_s17 = sshll.u32 (!%p122_p2), %s958_s10, 4 }
   0x6   : > { %125 = sbr.rel (%p122_p2) target bundleno = 576 (0x240), region = 28  ;;  %p152_p3 = scmp.lt.s32.totalorder (!%p122_p2), %s1188_s17, 53 }
   0x7   : > { %p162_p4 = scmp.lt.s32.totalorder (!%p122_p2), %s1188_s17, 47 }
   0xb   : > { %v213_v0 = vld [vmem:[%s1580_s1 + $0xf0] sm:$0xff]  ;;  %v211_v1 = vld [vmem:[%s1580_s1 + $0xe0] sm:$0xff]  ;;  %v214_v2 = vld [vmem:[%s1580_s1 + $0xf8] sm:$0xff]  ;;  %s153_s29 = scalar_select %p152_p3, %s1188_s17, 53  ;;  %vm885_vm0 = vcmask 31744  }
   0xc   : > { %290 = vmatpush.msra.mxu0 %v213_v0  ;;  %355 = vmatpush.msra.mxu1 %v214_v2  ;;  %v212_v3 = vld [vmem:[%s1580_s1 + $0xe8] sm:$0xff]  ;;  %v209_v4 = vld [vmem:[%s1580_s1 + $0xd0] sm:$0xff]  ;;  %v210_v5 = vld [vmem:[%s1580_s1 + $0xd8] sm:$0xff]  ;;  %s1583_s17 = smov (!%p162_p4, %s1188_s17), 47 }
   0xd   : > { %v207_v6 = vld [vmem:[%s1580_s1 + $0xc0] sm:$0xff]  ;;  %v208_v7 = vld [vmem:[%s1580_s1 + $0xc8] sm:$0xff]  ;;  %v205_v8 = vld [vmem:[%s1580_s1 + $0xb0] sm:$0xff]  ;;  %s964_s12 = sshll.u32 %s153_s29, 3 }
   0xe   : > { %291 = vmatpush.msra.mxu0 %v211_v1  ;;  %356 = vmatpush.msra.mxu1 %v212_v3  ;;  %v206_v9 = vld [vmem:[%s1580_s1 + $0xb8] sm:$0xff]  ;;  %v203_v10 = vld [vmem:[%s1580_s1 + $0xa0] sm:$0xff]  ;;  %v204_v11 = vld [vmem:[%s1580_s1 + $0xa8] sm:$0xff]  ;;  %s1237_s10 = scalar_lea.vmem %s1579_s0, %s964_s12  ;;  %s966_s12 = sshll.u32 %s1583_s17, 3 }
   0xf   : > { %v201_v12 = vld [vmem:[%s1580_s1 + $0x90] sm:$0xff]  ;;  %v202_v13 = vld [vmem:[%s1580_s1 + $0x98] sm:$0xff]  ;;  %v199_v14 = vld [vmem:[%s1580_s1 + $0x80] sm:$0xff]  ;;  %s1542_s15 = scalar_lea.vmem %s1581_s2, %s966_s12 }
  0x10   : > { %292 = vmatpush.msra.mxu0 %v209_v4  ;;  %357 = vmatpush.msra.mxu1 %v210_v5  ;;  %v200_v15 = vld [vmem:[%s1580_s1 + $0x88] sm:$0xff]  ;;  %v197_v16 = vld [vmem:[%s1580_s1 + $0x70] sm:$0xff]  ;;  %v198_v17 = vld [vmem:[%s1580_s1 + $0x78] sm:$0xff] }
  0x11   : > { %v195_v18 = vld [vmem:[%s1580_s1 + $0x60] sm:$0xff]  ;;  %v196_v19 = vld [vmem:[%s1580_s1 + $0x68] sm:$0xff]  ;;  %v193_v20 = vld [vmem:[%s1580_s1 + $0x50] sm:$0xff] }
  0x12   : > { %293 = vmatpush.msra.mxu0 %v207_v6  ;;  %358 = vmatpush.msra.mxu1 %v208_v7  ;;  %v194_v21 = vld [vmem:[%s1580_s1 + $0x58] sm:$0xff]  ;;  %v191_v22 = vld [vmem:[%s1580_s1 + $0x40] sm:$0xff]  ;;  %v192_v23 = vld [vmem:[%s1580_s1 + $0x48] sm:$0xff] }
  0x13   : > { %v189_v24 = vld [vmem:[%s1580_s1 + $0x30] sm:$0xff]  ;;  %v190_v25 = vld [vmem:[%s1580_s1 + $0x38] sm:$0xff]  ;;  %v187_v26 = vld [vmem:[%s1580_s1 + $0x20] sm:$0xff] }
  0x14   : > { %294 = vmatpush.msra.mxu0 %v205_v8  ;;  %359 = vmatpush.msra.mxu1 %v206_v9  ;;  %v188_v27 = vld [vmem:[%s1580_s1 + $0x28] sm:$0xff]  ;;  %v185_v28 = vld [vmem:[%s1580_s1 + $0x10] sm:$0xff]  ;;  %v186_v29 = vld [vmem:[%s1580_s1 + $0x18] sm:$0xff] }
  0x15   : > { %v183_v30 = vld [vmem:[%s1580_s1] sm:$0xff]  ;;  %v184_v31 = vld [vmem:[%s1580_s1 + $0x8] sm:$0xff]  ;;  %v246_v33 = vld [vmem:[%s1580_s1 + $0x1f8] sm:$0xff] }
  0x16   : > { %295 = vmatpush.msra.mxu0 %v203_v10  ;;  %360 = vmatpush.msra.mxu1 %v204_v11  ;;  %v167_v32 = vld [vmem:[%s1237_s10] sm:$0xff]  ;;  %v278_v34 = vld [vmem:[%s1580_s1 + $0x2f8] sm:$0xff]  ;;  %v244_v35 = vld [vmem:[%s1580_s1 + $0x1e8] sm:$0xff] }
  0x17   : > { %v276_v36 = vld [vmem:[%s1580_s1 + $0x2e8] sm:$0xff]  ;;  %v242_v37 = vld [vmem:[%s1580_s1 + $0x1d8] sm:$0xff]  ;;  %v169_v44 = vld [vmem:[%s1237_s10 + $0x10] sm:$0xff] }
  0x18   : > { %296 = vmatpush.msra.mxu0 %v201_v12  ;;  %361 = vmatpush.msra.mxu1 %v202_v13  ;;  %v274_v38 = vld [vmem:[%s1580_s1 + $0x2d8] sm:$0xff]  ;;  %v240_v39 = vld [vmem:[%s1580_s1 + $0x1c8] sm:$0xff]  ;;  %v171_v50 = vld [vmem:[%s1237_s10 + $0x20] sm:$0xff] }
  0x19   : > { %v272_v40 = vld [vmem:[%s1580_s1 + $0x2c8] sm:$0xff]  ;;  %v238_v42 = vld [vmem:[%s1580_s1 + $0x1b8] sm:$0xff]  ;;  %v173_v56 = vld [vmem:[%s1237_s10 + $0x30] sm:$0xff] }
  0x1a   : > { %297 = vmatpush.msra.mxu0 %v199_v14  ;;  %362 = vmatpush.msra.mxu1 %v200_v15  ;;  %v168_v41 = vld [vmem:[%s1237_s10 + $0x8] sm:$0xff]  ;;  %v270_v43 = vld [vmem:[%s1580_s1 + $0x2b8] sm:$0xff]  ;;  %v175_v62 = vld [vmem:[%s1237_s10 + $0x40] sm:$0xff] }
  0x1b   : > { %v236_v45 = vld [vmem:[%s1580_s1 + $0x1a8] sm:$0xff]  ;;  %v170_v47 = vld [vmem:[%s1237_s10 + $0x18] sm:$0xff]  ;;  %v245_v2 = vld [vmem:[%s1580_s1 + $0x1f0] sm:$0xff] }
  0x1c   : > { %298 = vmatpush.msra.mxu0 %v197_v16  ;;  %363 = vmatpush.msra.mxu1 %v198_v17  ;;  %v268_v46 = vld [vmem:[%s1580_s1 + $0x2a8] sm:$0xff]  ;;  %v234_v48 = vld [vmem:[%s1580_s1 + $0x198] sm:$0xff]  ;;  %v243_v3 = vld [vmem:[%s1580_s1 + $0x1e0] sm:$0xff] }
  0x1d   : > { %v266_v49 = vld [vmem:[%s1580_s1 + $0x298] sm:$0xff]  ;;  %v232_v51 = vld [vmem:[%s1580_s1 + $0x188] sm:$0xff]  ;;  %v277_v4 = vld [vmem:[%s1580_s1 + $0x2f0] sm:$0xff]  ;;  %457 = vmatpush.msra.mxu2 %v245_v2 }
  0x1e   : > { %299 = vmatpush.msra.mxu0 %v195_v18  ;;  %364 = vmatpush.msra.mxu1 %v196_v19  ;;  %v264_v52 = vld [vmem:[%s1580_s1 + $0x288] sm:$0xff]  ;;  %v230_v54 = vld [vmem:[%s1580_s1 + $0x178] sm:$0xff]  ;;  %v275_v5 = vld [vmem:[%s1580_s1 + $0x2e0] sm:$0xff] }
  0x1f   : > { %v172_v53 = vld [vmem:[%s1237_s10 + $0x28] sm:$0xff]  ;;  %v262_v55 = vld [vmem:[%s1580_s1 + $0x278] sm:$0xff]  ;;  %522 = vmatpush.msra.mxu3 %v277_v4  ;;  %v241_v7 = vld [vmem:[%s1580_s1 + $0x1d0] sm:$0xff]  ;;  %458 = vmatpush.msra.mxu2 %v243_v3 }
  0x20   : > { %300 = vmatpush.msra.mxu0 %v193_v20  ;;  %365 = vmatpush.msra.mxu1 %v194_v21  ;;  %v228_v57 = vld [vmem:[%s1580_s1 + $0x168] sm:$0xff]  ;;  %v174_v59 = vld [vmem:[%s1237_s10 + $0x38] sm:$0xff]  ;;  %v273_v8 = vld [vmem:[%s1580_s1 + $0x2d0] sm:$0xff] }
  0x21   : > { %v260_v58 = vld [vmem:[%s1580_s1 + $0x268] sm:$0xff]  ;;  %v226_v60 = vld [vmem:[%s1580_s1 + $0x158] sm:$0xff]  ;;  %523 = vmatpush.msra.mxu3 %v275_v5  ;;  %v239_v10 = vld [vmem:[%s1580_s1 + $0x1c0] sm:$0xff]  ;;  %459 = vmatpush.msra.mxu2 %v241_v7 }
  0x22   : > { %301 = vmatpush.msra.mxu0 %v191_v22  ;;  %366 = vmatpush.msra.mxu1 %v192_v23  ;;  %v258_v61 = vld [vmem:[%s1580_s1 + $0x258] sm:$0xff]  ;;  %v224_v63 = vld [vmem:[%s1580_s1 + $0x148] sm:$0xff]  ;;  %v177_v11 = vld [vmem:[%s1237_s10 + $0x50] sm:$0xff] }
  0x23   : > { %v256_v0 = vld [vmem:[%s1580_s1 + $0x248] sm:$0xff]  ;;  %v222_v6 = vld [vmem:[%s1580_s1 + $0x138] sm:$0xff]  ;;  %524 = vmatpush.msra.mxu3 %v273_v8  ;;  %460 = vmatpush.msra.mxu2 %v239_v10  ;;  %v237_v12 = vld [vmem:[%s1580_s1 + $0x1b0] sm:$0xff] }
  0x24   : > { %302 = vmatpush.msra.mxu0 %v189_v24  ;;  %367 = vmatpush.msra.mxu1 %v190_v25  ;;  %v176_v1 = vld [vmem:[%s1237_s10 + $0x48] sm:$0xff]  ;;  %v254_v9 = vld [vmem:[%s1580_s1 + $0x238] sm:$0xff]  ;;  %v271_v13 = vld [vmem:[%s1580_s1 + $0x2c0] sm:$0xff] }
  0x25   : > { %v235_v14 = vld [vmem:[%s1580_s1 + $0x1a0] sm:$0xff]  ;;  %v269_v15 = vld [vmem:[%s1580_s1 + $0x2b0] sm:$0xff]  ;;  %461 = vmatpush.msra.mxu2 %v237_v12  ;;  %525 = vmatpush.msra.mxu3 %v271_v13  ;;  %v220_v16 = vld [vmem:[%s1580_s1 + $0x128] sm:$0xff] }
  0x26   : > { %303 = vmatpush.msra.mxu0 %v187_v26  ;;  %368 = vmatpush.msra.mxu1 %v188_v27  ;;  %v233_v17 = vld [vmem:[%s1580_s1 + $0x190] sm:$0xff]  ;;  %v267_v18 = vld [vmem:[%s1580_s1 + $0x2a0] sm:$0xff]  ;;  %v252_v19 = vld [vmem:[%s1580_s1 + $0x228] sm:$0xff] }
  0x27   : > { %462 = vmatpush.msra.mxu2 %v235_v14  ;;  %526 = vmatpush.msra.mxu3 %v269_v15  ;;  %v231_v20 = vld [vmem:[%s1580_s1 + $0x180] sm:$0xff]  ;;  %v265_v21 = vld [vmem:[%s1580_s1 + $0x290] sm:$0xff]  ;;  %v178_v22 = vld [vmem:[%s1237_s10 + $0x58] sm:$0xff] }
  0x28   : > { %304 = vmatpush.msra.mxu0 %v185_v28  ;;  %369 = vmatpush.msra.mxu1 %v186_v29  ;;  %v229_v23 = vld [vmem:[%s1580_s1 + $0x170] sm:$0xff]  ;;  %v263_v24 = vld [vmem:[%s1580_s1 + $0x280] sm:$0xff] }
  0x29   : > { %463 = vmatpush.msra.mxu2 %v233_v17  ;;  %527 = vmatpush.msra.mxu3 %v267_v18  ;;  %v227_v25 = vld [vmem:[%s1580_s1 + $0x160] sm:$0xff]  ;;  %v261_v26 = vld [vmem:[%s1580_s1 + $0x270] sm:$0xff] }
  0x2a   : > { %305 = vmatpush.msra.mxu0 %v183_v30  ;;  %370 = vmatpush.msra.mxu1 %v184_v31  ;;  %v225_v27 = vld [vmem:[%s1580_s1 + $0x150] sm:$0xff]  ;;  %v259_v28 = vld [vmem:[%s1580_s1 + $0x260] sm:$0xff] }
  0x2b   : > { %306 = vmatmul.f32.vlgmr.msra.gmra.mxu0 %v167_v32  ;;  %371 = vmatmul.f32.vlgmr.msra.gmra.mxu1 %v167_v32  ;;  %v179_v29 = vld [vmem:[%s1237_s10 + $0x60] sm:$0xff]  ;;  %v257_v31 = vld [vmem:[%s1580_s1 + $0x250] sm:$0xff] }
  0x2c   : > { %587 = vmatpush.msrb.mxu0 %v246_v33  ;;  %652 = vmatpush.msrb.mxu1 %v278_v34  ;;  %v223_v30 = vld [vmem:[%s1580_s1 + $0x140] sm:$0xff]  ;;  %v221_v32 = vld [vmem:[%s1580_s1 + $0x130] sm:$0xff]  ;;  %v218_v34 = vld [vmem:[%s1580_s1 + $0x118] sm:$0xff] }
  0x2d   : > { %464 = vmatpush.msra.mxu2 %v231_v20  ;;  %528 = vmatpush.msra.mxu3 %v265_v21  ;;  %v255_v33 = vld [vmem:[%s1580_s1 + $0x240] sm:$0xff] }
  0x2e   : > { %588 = vmatpush.msrb.mxu0 %v244_v35  ;;  %653 = vmatpush.msrb.mxu1 %v276_v36  ;;  %v250_v35 = vld [vmem:[%s1580_s1 + $0x218] sm:$0xff]  ;;  %v219_v36 = vld [vmem:[%s1580_s1 + $0x120] sm:$0xff] }
  0x2f   : > { %465 = vmatpush.msra.mxu2 %v229_v23  ;;  %529 = vmatpush.msra.mxu3 %v263_v24 }
  0x30   : > { %589 = vmatpush.msrb.mxu0 %v242_v37  ;;  %654 = vmatpush.msrb.mxu1 %v274_v38  ;;  %v253_v37 = vld [vmem:[%s1580_s1 + $0x230] sm:$0xff] }
  0x31   : > { %466 = vmatpush.msra.mxu2 %v227_v25  ;;  %530 = vmatpush.msra.mxu3 %v261_v26  ;;  %v217_v38 = vld [vmem:[%s1580_s1 + $0x110] sm:$0xff] }
  0x32   : > { %590 = vmatpush.msrb.mxu0 %v240_v39  ;;  %655 = vmatpush.msrb.mxu1 %v272_v40  ;;  %v251_v39 = vld [vmem:[%s1580_s1 + $0x220] sm:$0xff]  ;;  %v180_v40 = vld [vmem:[%s1237_s10 + $0x68] sm:$0xff] }
  0x33   : > { %309 = vmatmul.f32.gmra.mxu0 %v168_v41  ;;  %374 = vmatmul.f32.gmra.mxu1 %v168_v41  ;;  %v216_v41 = vld [vmem:[%s1580_s1 + $0x108] sm:$0xff] }
  0x34   : > { %591 = vmatpush.msrb.mxu0 %v238_v42  ;;  %656 = vmatpush.msrb.mxu1 %v270_v43  ;;  %v215_v42 = vld [vmem:[%s1580_s1 + $0x100] sm:$0xff]  ;;  %v249_v43 = vld [vmem:[%s1580_s1 + $0x210] sm:$0xff] }
  0x35   : > { %467 = vmatpush.msra.mxu2 %v225_v27  ;;  %531 = vmatpush.msra.mxu3 %v259_v28 }
  0x36   : > { %592 = vmatpush.msrb.mxu0 %v236_v45  ;;  %657 = vmatpush.msrb.mxu1 %v268_v46  ;;  %v247_v45 = vld [vmem:[%s1580_s1 + $0x200] sm:$0xff]  ;;  %v181_v46 = vld [vmem:[%s1237_s10 + $0x70] sm:$0xff] }
  0x37   : > { %468 = vmatpush.msra.mxu2 %v223_v30  ;;  %532 = vmatpush.msra.mxu3 %v257_v31 }
  0x38   : > { %593 = vmatpush.msrb.mxu0 %v234_v48  ;;  %658 = vmatpush.msrb.mxu1 %v266_v49  ;;  %v967_v48 = vld [vmem:[%s1580_s1 + $0x300] ss:$8 sm:$0x3]  ;;  %v283_v49 = vld [vmem:[%s1580_s1 + $0x300] sm:$0x3c] }
  0x39   : > { %469 = vmatpush.msra.mxu2 %v221_v32  ;;  %533 = vmatpush.msra.mxu3 %v255_v33 }
  0x3a   : > { %594 = vmatpush.msrb.mxu0 %v232_v51  ;;  %659 = vmatpush.msrb.mxu1 %v264_v52  ;;  %v751_v51 = vrot.slane %v283_v49, 2 }
  0x3b   : > { %312 = vmatmul.f32.gmra.mxu0 %v169_v44  ;;  %377 = vmatmul.f32.gmra.mxu1 %v169_v44  ;;  %v248_v44 = vld [vmem:[%s1580_s1 + $0x208] sm:$0xff] }
  0x3c   : > { %595 = vmatpush.msrb.mxu0 %v230_v54  ;;  %660 = vmatpush.msrb.mxu1 %v262_v55  ;;  %v1464_v54 = vperm.slane %v967_v48, 1 }
  0x3d   : > { %470 = vmatpush.msra.mxu2 %v219_v36  ;;  %534 = vmatpush.msra.mxu3 %v253_v37 }
  0x3e   : > { %596 = vmatpush.msrb.mxu0 %v228_v57  ;;  %661 = vmatpush.msrb.mxu1 %v260_v58 }
  0x3f   : > { %471 = vmatpush.msra.mxu2 %v217_v38  ;;  %535 = vmatpush.msra.mxu3 %v251_v39 }
  0x40   : > { %597 = vmatpush.msrb.mxu0 %v226_v60  ;;  %662 = vmatpush.msrb.mxu1 %v258_v61 }
  0x41   : > { %472 = vmatpush.msra.mxu2 %v215_v42  ;;  %536 = vmatpush.msra.mxu3 %v249_v43 }
  0x42   : > { %598 = vmatpush.msrb.mxu0 %v224_v63  ;;  %663 = vmatpush.msrb.mxu1 %v256_v0 }
  0x43   : > { %315 = vmatmul.f32.gmra.mxu0 %v170_v47  ;;  %380 = vmatmul.f32.gmra.mxu1 %v170_v47  ;;  %v182_v47 = vld [vmem:[%s1237_s10 + $0x78] sm:$0xff] }
  0x44   : > { %599 = vmatpush.msrb.mxu0 %v222_v6  ;;  %664 = vmatpush.msrb.mxu1 %v254_v9 }
  0x45   : > { %537 = vmatpush.msra.mxu3 %v247_v45  ;;  %770 = vmatpush.xpose.msrb.mxu2 %v751_v51 }
  0x46   : > { %600 = vmatpush.msrb.mxu0 %v220_v16  ;;  %665 = vmatpush.msrb.mxu1 %v252_v19 }
  0x48   : > { %601 = vmatpush.msrb.mxu0 %v218_v34  ;;  %666 = vmatpush.msrb.mxu1 %v250_v35 }
  0x4a   : > { %602 = vmatpush.msrb.mxu0 %v216_v41  ;;  %667 = vmatpush.msrb.mxu1 %v248_v44 }
  0x4b   : > { %318 = vmatmul.f32.gmra.mxu0 %v171_v50  ;;  %383 = vmatmul.f32.gmra.mxu1 %v171_v50  ;;  %v284_v50 = vld [vmem:[%s1580_s1 + $0x308] sm:$0x3c] }
  0x4c   : > { %v752_v52 = vrot.slane %v284_v50, 2 }
  0x4e   : > { %835 = vmatpush.xpose.msrb.mxu3 %v752_v52 }
  0x53   : > { %321 = vmatmul.f32.gmra.mxu0 %v172_v53  ;;  %386 = vmatmul.f32.gmra.mxu1 %v172_v53  ;;  %v1462_v53 = vperm.slane %v967_v48, 0 }
  0x5b   : > { %324 = vmatmul.f32.gmra.mxu0 %v173_v56  ;;  %389 = vmatmul.f32.gmra.mxu1 %v173_v56 }
  0x63   : > { %327 = vmatmul.f32.gmra.mxu0 %v174_v59  ;;  %392 = vmatmul.f32.gmra.mxu1 %v174_v59 }
  0x6b   : > { %330 = vmatmul.f32.gmra.mxu0 %v175_v62  ;;  %395 = vmatmul.f32.gmra.mxu1 %v175_v62 }
  0x73   : > { %333 = vmatmul.f32.gmra.mxu0 %v176_v1  ;;  %398 = vmatmul.f32.gmra.mxu1 %v176_v1 }
  0x7b   : > { %336 = vmatmul.f32.gmra.mxu0 %v177_v11  ;;  %401 = vmatmul.f32.gmra.mxu1 %v177_v11 }
  0x83   : > { %339 = vmatmul.f32.gmra.mxu0 %v178_v22  ;;  %404 = vmatmul.f32.gmra.mxu1 %v178_v22 }
  0x8b   : > { %342 = vmatmul.f32.gmra.mxu0 %v179_v29  ;;  %407 = vmatmul.f32.gmra.mxu1 %v179_v29 }
  0x93   : > { %345 = vmatmul.f32.gmra.mxu0 %v180_v40  ;;  %410 = vmatmul.f32.gmra.mxu1 %v180_v40 }
  0x9b   : > { %348 = vmatmul.f32.gmra.mxu0 %v181_v46  ;;  %413 = vmatmul.f32.gmra.mxu1 %v181_v46 }
  0xa3   : > { %351 = vmatmul.f32.gmra.mxu0 %v182_v47  ;;  %416 = vmatmul.f32.gmra.mxu1 %v182_v47 }
  0xa8   : > { %v307_v55 = vpop.f32.mrf.mxu0  ;;  %v372_v56 = vpop.f32.mrf.mxu1 }
  0xa9   : > { %v308_v57 = vadd.f32 %v307_v55, %v1462_v53  ;;  %v373_v58 = vadd.f32 %v372_v56, %v1464_v54 }
  0xab   : > { %979 = vtanh.f32 %v308_v57 }
  0xac   : > { %981 = vtanh.f32 %v373_v58 }
  0xb0   : > { %v310_v59 = vpop.f32.mrf.mxu0  ;;  %v375_v60 = vpop.f32.mrf.mxu1 }
  0xb1   : > { %v980_v61 = vpop.eup %979  ;;  %v311_v62 = vadd.f32 %v310_v59, %v1462_v53  ;;  %v376_v63 = vadd.f32 %v375_v60, %v1464_v54 }
  0xb2   : > { %v982_v0 = vpop.eup %981  ;;  %473 = vmatmul.f32.vlgmr.msra.gmra.mxu2 %v980_v61  ;;  %603 = vmatmul.f32.vlgmr.msrb.gmra.mxu0 %v980_v61 }
  0xb3   : > { %983 = vtanh.f32 %v311_v62  ;;  %538 = vmatmul.f32.vlgmr.msra.gmra.mxu3 %v982_v0  ;;  %668 = vmatmul.f32.vlgmr.msrb.gmra.mxu1 %v982_v0 }
  0xb4   : > { %985 = vtanh.f32 %v376_v63 }
  0xb8   : > { %v313_v1 = vpop.f32.mrf.mxu0  ;;  %v378_v2 = vpop.f32.mrf.mxu1 }
  0xb9   : > { %v984_v3 = vpop.eup %983  ;;  %v314_v4 = vadd.f32 %v313_v1, %v1462_v53  ;;  %v379_v5 = vadd.f32 %v378_v2, %v1464_v54 }
  0xba   : > { %v986_v6 = vpop.eup %985  ;;  %476 = vmatmul.f32.gmra.mxu2 %v984_v3  ;;  %606 = vmatmul.f32.gmra.mxu0 %v984_v3 }
  0xbb   : > { %987 = vtanh.f32 %v314_v4  ;;  %541 = vmatmul.f32.gmra.mxu3 %v986_v6  ;;  %671 = vmatmul.f32.gmra.mxu1 %v986_v6 }
  0xbc   : > { %989 = vtanh.f32 %v379_v5 }
  0xc0   : > { %v316_v7 = vpop.f32.mrf.mxu0  ;;  %v381_v8 = vpop.f32.mrf.mxu1 }
  0xc1   : > { %v988_v9 = vpop.eup %987  ;;  %v317_v10 = vadd.f32 %v316_v7, %v1462_v53  ;;  %v382_v11 = vadd.f32 %v381_v8, %v1464_v54 }
  0xc2   : > { %v990_v12 = vpop.eup %989  ;;  %479 = vmatmul.f32.gmra.mxu2 %v988_v9  ;;  %609 = vmatmul.f32.gmra.mxu0 %v988_v9 }
  0xc3   : > { %991 = vtanh.f32 %v317_v10  ;;  %544 = vmatmul.f32.gmra.mxu3 %v990_v12  ;;  %674 = vmatmul.f32.gmra.mxu1 %v990_v12 }
  0xc4   : > { %993 = vtanh.f32 %v382_v11 }
  0xc8   : > { %v319_v13 = vpop.f32.mrf.mxu0  ;;  %v384_v14 = vpop.f32.mrf.mxu1 }
  0xc9   : > { %v992_v15 = vpop.eup %991  ;;  %v320_v16 = vadd.f32 %v319_v13, %v1462_v53  ;;  %v385_v17 = vadd.f32 %v384_v14, %v1464_v54 }
  0xca   : > { %v994_v18 = vpop.eup %993  ;;  %482 = vmatmul.f32.gmra.mxu2 %v992_v15  ;;  %612 = vmatmul.f32.gmra.mxu0 %v992_v15 }
  0xcb   : > { %995 = vtanh.f32 %v320_v16  ;;  %547 = vmatmul.f32.gmra.mxu3 %v994_v18  ;;  %677 = vmatmul.f32.gmra.mxu1 %v994_v18 }
  0xcc   : > { %997 = vtanh.f32 %v385_v17 }
  0xd0   : > { %v322_v19 = vpop.f32.mrf.mxu0  ;;  %v387_v20 = vpop.f32.mrf.mxu1 }
  0xd1   : > { %v996_v21 = vpop.eup %995  ;;  %v323_v22 = vadd.f32 %v322_v19, %v1462_v53  ;;  %v388_v23 = vadd.f32 %v387_v20, %v1464_v54 }
  0xd2   : > { %v998_v24 = vpop.eup %997  ;;  %485 = vmatmul.f32.gmra.mxu2 %v996_v21  ;;  %615 = vmatmul.f32.gmra.mxu0 %v996_v21 }
  0xd3   : > { %999 = vtanh.f32 %v323_v22  ;;  %550 = vmatmul.f32.gmra.mxu3 %v998_v24  ;;  %680 = vmatmul.f32.gmra.mxu1 %v998_v24  ;;  %v968_v24 = vld [vmem:[%s1580_s1 + $0x301] ss:$8 sm:$0x3] }
  0xd4   : > { %1001 = vtanh.f32 %v388_v23 }
  0xd8   : > { %v325_v25 = vpop.f32.mrf.mxu0  ;;  %v390_v26 = vpop.f32.mrf.mxu1 }
  0xd9   : > { %v1000_v27 = vpop.eup %999  ;;  %v326_v28 = vadd.f32 %v325_v25, %v1462_v53  ;;  %v391_v29 = vadd.f32 %v390_v26, %v1464_v54 }
  0xda   : > { %v1002_v30 = vpop.eup %1001  ;;  %488 = vmatmul.f32.gmra.mxu2 %v1000_v27  ;;  %618 = vmatmul.f32.gmra.mxu0 %v1000_v27 }
  0xdb   : > { %1003 = vtanh.f32 %v326_v28  ;;  %553 = vmatmul.f32.gmra.mxu3 %v1002_v30  ;;  %683 = vmatmul.f32.gmra.mxu1 %v1002_v30 }
  0xdc   : > { %1005 = vtanh.f32 %v391_v29  ;;  %v1504_v29 = vperm.slane %v968_v24, 0 }
  0xe0   : > { %v328_v31 = vpop.f32.mrf.mxu0  ;;  %v393_v32 = vpop.f32.mrf.mxu1 }
  0xe1   : > { %v1004_v33 = vpop.eup %1003  ;;  %v329_v34 = vadd.f32 %v328_v31, %v1462_v53  ;;  %v394_v35 = vadd.f32 %v393_v32, %v1464_v54 }
  0xe2   : > { %v1006_v36 = vpop.eup %1005  ;;  %491 = vmatmul.f32.gmra.mxu2 %v1004_v33  ;;  %621 = vmatmul.f32.gmra.mxu0 %v1004_v33 }
  0xe3   : > { %1007 = vtanh.f32 %v329_v34  ;;  %556 = vmatmul.f32.gmra.mxu3 %v1006_v36  ;;  %686 = vmatmul.f32.gmra.mxu1 %v1006_v36 }
  0xe4   : > { %1009 = vtanh.f32 %v394_v35 }
  0xe8   : > { %v331_v37 = vpop.f32.mrf.mxu0  ;;  %v396_v38 = vpop.f32.mrf.mxu1 }
  0xe9   : > { %v1008_v39 = vpop.eup %1007  ;;  %v332_v40 = vadd.f32 %v331_v37, %v1462_v53  ;;  %v397_v41 = vadd.f32 %v396_v38, %v1464_v54 }
  0xea   : > { %v1010_v42 = vpop.eup %1009  ;;  %494 = vmatmul.f32.gmra.mxu2 %v1008_v39  ;;  %624 = vmatmul.f32.gmra.mxu0 %v1008_v39 }
  0xeb   : > { %1011 = vtanh.f32 %v332_v40  ;;  %559 = vmatmul.f32.gmra.mxu3 %v1010_v42  ;;  %689 = vmatmul.f32.gmra.mxu1 %v1010_v42 }
  0xec   : > { %1013 = vtanh.f32 %v397_v41 }
  0xf0   : > { %v334_v43 = vpop.f32.mrf.mxu0  ;;  %v399_v44 = vpop.f32.mrf.mxu1 }
  0xf1   : > { %v1012_v45 = vpop.eup %1011  ;;  %v335_v46 = vadd.f32 %v334_v43, %v1462_v53  ;;  %v400_v47 = vadd.f32 %v399_v44, %v1464_v54 }
  0xf2   : > { %v1014_v48 = vpop.eup %1013  ;;  %497 = vmatmul.f32.gmra.mxu2 %v1012_v45  ;;  %627 = vmatmul.f32.gmra.mxu0 %v1012_v45 }
  0xf3   : > { %1015 = vtanh.f32 %v335_v46  ;;  %562 = vmatmul.f32.gmra.mxu3 %v1014_v48  ;;  %692 = vmatmul.f32.gmra.mxu1 %v1014_v48 }
  0xf4   : > { %1017 = vtanh.f32 %v400_v47 }
  0xf8   : > { %v337_v49 = vpop.f32.mrf.mxu0  ;;  %v402_v50 = vpop.f32.mrf.mxu1 }
  0xf9   : > { %v1016_v51 = vpop.eup %1015  ;;  %v338_v52 = vadd.f32 %v337_v49, %v1462_v53  ;;  %v403_v55 = vadd.f32 %v402_v50, %v1464_v54 }
  0xfa   : > { %v1018_v56 = vpop.eup %1017  ;;  %500 = vmatmul.f32.gmra.mxu2 %v1016_v51  ;;  %630 = vmatmul.f32.gmra.mxu0 %v1016_v51 }
  0xfb   : > { %1019 = vtanh.f32 %v338_v52  ;;  %565 = vmatmul.f32.gmra.mxu3 %v1018_v56  ;;  %695 = vmatmul.f32.gmra.mxu1 %v1018_v56 }
  0xfc   : > { %1021 = vtanh.f32 %v403_v55 }
 0x100   : > { %v340_v57 = vpop.f32.mrf.mxu0  ;;  %v405_v58 = vpop.f32.mrf.mxu1 }
 0x101   : > { %v1020_v59 = vpop.eup %1019  ;;  %v341_v60 = vadd.f32 %v340_v57, %v1462_v53  ;;  %v406_v61 = vadd.f32 %v405_v58, %v1464_v54 }
 0x102   : > { %v1022_v62 = vpop.eup %1021  ;;  %503 = vmatmul.f32.gmra.mxu2 %v1020_v59  ;;  %633 = vmatmul.f32.gmra.mxu0 %v1020_v59 }
 0x103   : > { %1023 = vtanh.f32 %v341_v60  ;;  %568 = vmatmul.f32.gmra.mxu3 %v1022_v62  ;;  %698 = vmatmul.f32.gmra.mxu1 %v1022_v62 }
 0x104   : > { %1025 = vtanh.f32 %v406_v61 }
 0x108   : > { %v343_v63 = vpop.f32.mrf.mxu0  ;;  %v408_v0 = vpop.f32.mrf.mxu1 }
 0x109   : > { %v1024_v1 = vpop.eup %1023  ;;  %v344_v2 = vadd.f32 %v343_v63, %v1462_v53  ;;  %v409_v3 = vadd.f32 %v408_v0, %v1464_v54 }
 0x10a   : > { %v1026_v4 = vpop.eup %1025  ;;  %506 = vmatmul.f32.gmra.mxu2 %v1024_v1  ;;  %636 = vmatmul.f32.gmra.mxu0 %v1024_v1 }
 0x10b   : > { %1027 = vtanh.f32 %v344_v2  ;;  %571 = vmatmul.f32.gmra.mxu3 %v1026_v4  ;;  %701 = vmatmul.f32.gmra.mxu1 %v1026_v4 }
 0x10c   : > { %1029 = vtanh.f32 %v409_v3 }
 0x110   : > { %v346_v5 = vpop.f32.mrf.mxu0  ;;  %v411_v6 = vpop.f32.mrf.mxu1 }
 0x111   : > { %v1028_v7 = vpop.eup %1027  ;;  %v347_v8 = vadd.f32 %v346_v5, %v1462_v53  ;;  %v412_v9 = vadd.f32 %v411_v6, %v1464_v54 }
 0x112   : > { %v1030_v10 = vpop.eup %1029  ;;  %509 = vmatmul.f32.gmra.mxu2 %v1028_v7  ;;  %639 = vmatmul.f32.gmra.mxu0 %v1028_v7 }
 0x113   : > { %1031 = vtanh.f32 %v347_v8  ;;  %574 = vmatmul.f32.gmra.mxu3 %v1030_v10  ;;  %704 = vmatmul.f32.gmra.mxu1 %v1030_v10 }
 0x114   : > { %1033 = vtanh.f32 %v412_v9 }
 0x118   : > { %v349_v11 = vpop.f32.mrf.mxu0  ;;  %v414_v12 = vpop.f32.mrf.mxu1 }
 0x119   : > { %v1032_v13 = vpop.eup %1031  ;;  %v350_v14 = vadd.f32 %v349_v11, %v1462_v53  ;;  %v415_v15 = vadd.f32 %v414_v12, %v1464_v54 }
 0x11a   : > { %v1034_v16 = vpop.eup %1033  ;;  %512 = vmatmul.f32.gmra.mxu2 %v1032_v13  ;;  %642 = vmatmul.f32.gmra.mxu0 %v1032_v13 }
 0x11b   : > { %1035 = vtanh.f32 %v350_v14  ;;  %577 = vmatmul.f32.gmra.mxu3 %v1034_v16  ;;  %707 = vmatmul.f32.gmra.mxu1 %v1034_v16 }
 0x11c   : > { %1037 = vtanh.f32 %v415_v15 }
 0x120   : > { %v352_v17 = vpop.f32.mrf.mxu0  ;;  %v417_v18 = vpop.f32.mrf.mxu1 }
 0x121   : > { %v1036_v19 = vpop.eup %1035  ;;  %v353_v20 = vadd.f32 %v352_v17, %v1462_v53  ;;  %v418_v21 = vadd.f32 %v417_v18, %v1464_v54  ;;  %v1501_v53 = vperm.slane %v968_v24, 1 }
 0x122   : > { %v1038_v22 = vpop.eup %1037  ;;  %515 = vmatmul.f32.gmra.mxu2 %v1036_v19  ;;  %645 = vmatmul.f32.gmra.mxu0 %v1036_v19 }
 0x123   : > { %1039 = vtanh.f32 %v353_v20  ;;  %580 = vmatmul.f32.gmra.mxu3 %v1038_v22  ;;  %710 = vmatmul.f32.gmra.mxu1 %v1038_v22 }
 0x124   : > { %1041 = vtanh.f32 %v418_v21 }
 0x129   : > { %v1040_v23 = vpop.eup %1039 }
 0x12a   : > { %v1042_v25 = vpop.eup %1041  ;;  %518 = vmatmul.f32.gmra.mxu2 %v1040_v23  ;;  %648 = vmatmul.f32.gmra.mxu0 %v1040_v23 }
 0x12b   : > { %583 = vmatmul.f32.gmra.mxu3 %v1042_v25  ;;  %713 = vmatmul.f32.gmra.mxu1 %v1042_v25 }
 0x12f   : > { %v604_v54 = vpop.f32.mrf.mxu0 }
 0x130   : > { %v605_v26 = vadd.f32 %v604_v54, %v1501_v53  ;;  %v669_v27 = vpop.f32.mrf.mxu1 }
 0x132   : > { %v670_v28 = vadd.f32 %v669_v27, %v605_v26 }
 0x134   : > { %1043 = vtanh.f32 %v670_v28 }
 0x135   : > { %v474_v30 = vpop.f32.mrf.mxu2 }
 0x136   : > { %v475_v31 = vadd.f32 %v474_v30, %v1504_v29  ;;  %v539_v32 = vpop.f32.mrf.mxu3 }
 0x137   : > { %v607_v33 = vpop.f32.mrf.mxu0 }
 0x138   : > { %v540_v34 = vadd.f32 %v539_v32, %v475_v31  ;;  %v608_v35 = vadd.f32 %v607_v33, %v1501_v53  ;;  %v672_v36 = vpop.f32.mrf.mxu1 }
 0x13a   : > { %v1044_v37 = vpop.eup %1043  ;;  %1045 = vtanh.f32 %v540_v34  ;;  %v673_v38 = vadd.f32 %v672_v36, %v608_v35 }
 0x13b   : > { %836 = vmatmul.f32.vlgmr.msrb.gmra.mxu3 %v1044_v37 }
 0x13c   : > { %1047 = vtanh.f32 %v673_v38 }
 0x13d   : > { %v477_v39 = vpop.f32.mrf.mxu2 }
 0x13e   : > { %v478_v40 = vadd.f32 %v477_v39, %v1504_v29  ;;  %v542_v41 = vpop.f32.mrf.mxu3 }
 0x13f   : > { %v610_v42 = vpop.f32.mrf.mxu0 }
 0x140   : > { %v1046_v43 = vpop.eup %1045  ;;  %v543_v44 = vadd.f32 %v542_v41, %v478_v40  ;;  %v611_v45 = vadd.f32 %v610_v42, %v1501_v53  ;;  %v675_v46 = vpop.f32.mrf.mxu1 }
 0x141   : > { %771 = vmatmul.f32.vlgmr.msrb.gmra.mxu2 %v1046_v43 }
 0x142   : > { %v1048_v47 = vpop.eup %1047  ;;  %1049 = vtanh.f32 %v543_v44  ;;  %v676_v48 = vadd.f32 %v675_v46, %v611_v45 }
 0x143   : > { %839 = vmatmul.f32.gmra.mxu3 %v1048_v47 }
 0x144   : > { %1051 = vtanh.f32 %v676_v48 }
 0x145   : > { %v480_v49 = vpop.f32.mrf.mxu2 }
 0x146   : > { %v481_v50 = vadd.f32 %v480_v49, %v1504_v29  ;;  %v545_v51 = vpop.f32.mrf.mxu3 }
 0x147   : > { %v613_v52 = vpop.f32.mrf.mxu0 }
 0x148   : > { %v1050_v55 = vpop.eup %1049  ;;  %v546_v56 = vadd.f32 %v545_v51, %v481_v50  ;;  %v614_v57 = vadd.f32 %v613_v52, %v1501_v53  ;;  %v678_v58 = vpop.f32.mrf.mxu1 }
 0x149   : > { %774 = vmatmul.f32.gmra.mxu2 %v1050_v55 }
 0x14a   : > { %v1052_v59 = vpop.eup %1051  ;;  %1053 = vtanh.f32 %v546_v56  ;;  %v679_v60 = vadd.f32 %v678_v58, %v614_v57 }
 0x14b   : > { %842 = vmatmul.f32.gmra.mxu3 %v1052_v59 }
 0x14c   : > { %1055 = vtanh.f32 %v679_v60 }
 0x14d   : > { %v483_v61 = vpop.f32.mrf.mxu2 }
 0x14e   : > { %v484_v62 = vadd.f32 %v483_v61, %v1504_v29  ;;  %v548_v63 = vpop.f32.mrf.mxu3 }
 0x14f   : > { %v616_v0 = vpop.f32.mrf.mxu0 }
 0x150   : > { %v1054_v1 = vpop.eup %1053  ;;  %v549_v2 = vadd.f32 %v548_v63, %v484_v62  ;;  %v617_v3 = vadd.f32 %v616_v0, %v1501_v53  ;;  %v681_v4 = vpop.f32.mrf.mxu1 }
 0x151   : > { %777 = vmatmul.f32.gmra.mxu2 %v1054_v1 }
 0x152   : > { %v1056_v5 = vpop.eup %1055  ;;  %1057 = vtanh.f32 %v549_v2  ;;  %v682_v6 = vadd.f32 %v681_v4, %v617_v3 }
 0x153   : > { %845 = vmatmul.f32.gmra.mxu3 %v1056_v5 }
 0x154   : > { %1059 = vtanh.f32 %v682_v6 }
 0x155   : > { %v486_v7 = vpop.f32.mrf.mxu2 }
 0x156   : > { %v487_v8 = vadd.f32 %v486_v7, %v1504_v29  ;;  %v551_v9 = vpop.f32.mrf.mxu3 }
 0x157   : > { %v619_v10 = vpop.f32.mrf.mxu0 }
 0x158   : > { %v1058_v11 = vpop.eup %1057  ;;  %v552_v12 = vadd.f32 %v551_v9, %v487_v8  ;;  %v620_v13 = vadd.f32 %v619_v10, %v1501_v53  ;;  %v684_v14 = vpop.f32.mrf.mxu1 }
 0x159   : > { %780 = vmatmul.f32.gmra.mxu2 %v1058_v11 }
 0x15a   : > { %v1060_v15 = vpop.eup %1059  ;;  %1061 = vtanh.f32 %v552_v12  ;;  %v685_v16 = vadd.f32 %v684_v14, %v620_v13 }
 0x15b   : > { %848 = vmatmul.f32.gmra.mxu3 %v1060_v15 }
 0x15c   : > { %1063 = vtanh.f32 %v685_v16 }
 0x15d   : > { %v489_v17 = vpop.f32.mrf.mxu2 }
 0x15e   : > { %v490_v18 = vadd.f32 %v489_v17, %v1504_v29  ;;  %v554_v19 = vpop.f32.mrf.mxu3 }
 0x15f   : > { %v622_v20 = vpop.f32.mrf.mxu0 }
 0x160   : > { %v1062_v21 = vpop.eup %1061  ;;  %v555_v22 = vadd.f32 %v554_v19, %v490_v18  ;;  %v623_v23 = vadd.f32 %v622_v20, %v1501_v53  ;;  %v687_v24 = vpop.f32.mrf.mxu1 }
 0x161   : > { %783 = vmatmul.f32.gmra.mxu2 %v1062_v21 }
 0x162   : > { %v1064_v25 = vpop.eup %1063  ;;  %1065 = vtanh.f32 %v555_v22  ;;  %v688_v54 = vadd.f32 %v687_v24, %v623_v23 }
 0x163   : > { %851 = vmatmul.f32.gmra.mxu3 %v1064_v25 }
 0x164   : > { %1067 = vtanh.f32 %v688_v54 }
 0x165   : > { %v492_v26 = vpop.f32.mrf.mxu2 }
 0x166   : > { %v493_v27 = vadd.f32 %v492_v26, %v1504_v29  ;;  %v557_v28 = vpop.f32.mrf.mxu3 }
 0x167   : > { %v625_v30 = vpop.f32.mrf.mxu0 }
 0x168   : > { %v1066_v31 = vpop.eup %1065  ;;  %v558_v32 = vadd.f32 %v557_v28, %v493_v27  ;;  %v626_v33 = vadd.f32 %v625_v30, %v1501_v53  ;;  %v690_v34 = vpop.f32.mrf.mxu1 }
 0x169   : > { %786 = vmatmul.f32.gmra.mxu2 %v1066_v31 }
 0x16a   : > { %v1068_v35 = vpop.eup %1067  ;;  %1069 = vtanh.f32 %v558_v32  ;;  %v691_v36 = vadd.f32 %v690_v34, %v626_v33 }
 0x16b   : > { %854 = vmatmul.f32.gmra.mxu3 %v1068_v35 }
 0x16c   : > { %1071 = vtanh.f32 %v691_v36 }
 0x16d   : > { %v495_v37 = vpop.f32.mrf.mxu2 }
 0x16e   : > { %v496_v38 = vadd.f32 %v495_v37, %v1504_v29  ;;  %v560_v39 = vpop.f32.mrf.mxu3 }
 0x16f   : > { %v628_v40 = vpop.f32.mrf.mxu0 }
 0x170   : > { %v1070_v41 = vpop.eup %1069  ;;  %v561_v42 = vadd.f32 %v560_v39, %v496_v38  ;;  %v629_v43 = vadd.f32 %v628_v40, %v1501_v53  ;;  %v693_v44 = vpop.f32.mrf.mxu1 }
 0x171   : > { %789 = vmatmul.f32.gmra.mxu2 %v1070_v41 }
 0x172   : > { %v1072_v45 = vpop.eup %1071  ;;  %1073 = vtanh.f32 %v561_v42  ;;  %v694_v46 = vadd.f32 %v693_v44, %v629_v43 }
 0x173   : > { %857 = vmatmul.f32.gmra.mxu3 %v1072_v45 }
 0x174   : > { %1075 = vtanh.f32 %v694_v46 }
 0x175   : > { %v498_v47 = vpop.f32.mrf.mxu2 }
 0x176   : > { %v499_v48 = vadd.f32 %v498_v47, %v1504_v29  ;;  %v563_v49 = vpop.f32.mrf.mxu3 }
 0x177   : > { %v631_v50 = vpop.f32.mrf.mxu0 }
 0x178   : > { %v1074_v51 = vpop.eup %1073  ;;  %v564_v52 = vadd.f32 %v563_v49, %v499_v48  ;;  %v632_v55 = vadd.f32 %v631_v50, %v1501_v53  ;;  %v696_v56 = vpop.f32.mrf.mxu1 }
 0x179   : > { %792 = vmatmul.f32.gmra.mxu2 %v1074_v51 }
 0x17a   : > { %v1076_v57 = vpop.eup %1075  ;;  %1077 = vtanh.f32 %v564_v52  ;;  %v697_v58 = vadd.f32 %v696_v56, %v632_v55 }
 0x17b   : > { %860 = vmatmul.f32.gmra.mxu3 %v1076_v57 }
 0x17c   : > { %1079 = vtanh.f32 %v697_v58 }
 0x17d   : > { %v501_v59 = vpop.f32.mrf.mxu2 }
 0x17e   : > { %v502_v60 = vadd.f32 %v501_v59, %v1504_v29  ;;  %v566_v61 = vpop.f32.mrf.mxu3 }
 0x17f   : > { %v634_v62 = vpop.f32.mrf.mxu0 }
 0x180   : > { %v1078_v63 = vpop.eup %1077  ;;  %v567_v0 = vadd.f32 %v566_v61, %v502_v60  ;;  %v635_v1 = vadd.f32 %v634_v62, %v1501_v53  ;;  %v699_v2 = vpop.f32.mrf.mxu1 }
 0x181   : > { %795 = vmatmul.f32.gmra.mxu2 %v1078_v63 }
 0x182   : > { %v1080_v3 = vpop.eup %1079  ;;  %1081 = vtanh.f32 %v567_v0  ;;  %v700_v4 = vadd.f32 %v699_v2, %v635_v1 }
 0x183   : > { %863 = vmatmul.f32.gmra.mxu3 %v1080_v3 }
 0x184   : > { %1083 = vtanh.f32 %v700_v4 }
 0x185   : > { %v504_v5 = vpop.f32.mrf.mxu2 }
 0x186   : > { %v505_v6 = vadd.f32 %v504_v5, %v1504_v29  ;;  %v569_v7 = vpop.f32.mrf.mxu3 }
 0x187   : > { %v637_v8 = vpop.f32.mrf.mxu0 }
 0x188   : > { %v1082_v9 = vpop.eup %1081  ;;  %v570_v10 = vadd.f32 %v569_v7, %v505_v6  ;;  %v638_v11 = vadd.f32 %v637_v8, %v1501_v53  ;;  %v702_v12 = vpop.f32.mrf.mxu1 }
 0x189   : > { %798 = vmatmul.f32.gmra.mxu2 %v1082_v9 }
 0x18a   : > { %v1084_v13 = vpop.eup %1083  ;;  %1085 = vtanh.f32 %v570_v10  ;;  %v703_v14 = vadd.f32 %v702_v12, %v638_v11 }
 0x18b   : > { %866 = vmatmul.f32.gmra.mxu3 %v1084_v13 }
 0x18c   : > { %1087 = vtanh.f32 %v703_v14 }
 0x18d   : > { %v507_v15 = vpop.f32.mrf.mxu2 }
 0x18e   : > { %v508_v16 = vadd.f32 %v507_v15, %v1504_v29  ;;  %v572_v17 = vpop.f32.mrf.mxu3 }
 0x18f   : > { %v640_v18 = vpop.f32.mrf.mxu0 }
 0x190   : > { %v1086_v19 = vpop.eup %1085  ;;  %v573_v20 = vadd.f32 %v572_v17, %v508_v16  ;;  %v641_v21 = vadd.f32 %v640_v18, %v1501_v53  ;;  %v705_v22 = vpop.f32.mrf.mxu1 }
 0x191   : > { %801 = vmatmul.f32.gmra.mxu2 %v1086_v19 }
 0x192   : > { %v1088_v23 = vpop.eup %1087  ;;  %1089 = vtanh.f32 %v573_v20  ;;  %v706_v24 = vadd.f32 %v705_v22, %v641_v21 }
 0x193   : > { %869 = vmatmul.f32.gmra.mxu3 %v1088_v23 }
 0x194   : > { %1091 = vtanh.f32 %v706_v24 }
 0x195   : > { %v510_v25 = vpop.f32.mrf.mxu2 }
 0x196   : > { %v511_v54 = vadd.f32 %v510_v25, %v1504_v29  ;;  %v575_v26 = vpop.f32.mrf.mxu3 }
 0x197   : > { %v643_v27 = vpop.f32.mrf.mxu0 }
 0x198   : > { %v1090_v28 = vpop.eup %1089  ;;  %v576_v30 = vadd.f32 %v575_v26, %v511_v54  ;;  %v644_v31 = vadd.f32 %v643_v27, %v1501_v53  ;;  %v708_v32 = vpop.f32.mrf.mxu1 }
 0x199   : > { %804 = vmatmul.f32.gmra.mxu2 %v1090_v28 }
 0x19a   : > { %v1092_v33 = vpop.eup %1091  ;;  %1093 = vtanh.f32 %v576_v30  ;;  %v709_v34 = vadd.f32 %v708_v32, %v644_v31 }
 0x19b   : > { %872 = vmatmul.f32.gmra.mxu3 %v1092_v33 }
 0x19c   : > { %1095 = vtanh.f32 %v709_v34 }
 0x19d   : > { %v513_v35 = vpop.f32.mrf.mxu2 }
 0x19e   : > { %v514_v36 = vadd.f32 %v513_v35, %v1504_v29  ;;  %v578_v37 = vpop.f32.mrf.mxu3 }
 0x19f   : > { %v646_v38 = vpop.f32.mrf.mxu0 }
 0x1a0   : > { %v1094_v39 = vpop.eup %1093  ;;  %v579_v40 = vadd.f32 %v578_v37, %v514_v36  ;;  %v647_v41 = vadd.f32 %v646_v38, %v1501_v53  ;;  %v711_v42 = vpop.f32.mrf.mxu1 }
 0x1a1   : > { %807 = vmatmul.f32.gmra.mxu2 %v1094_v39 }
 0x1a2   : > { %v1096_v43 = vpop.eup %1095  ;;  %1097 = vtanh.f32 %v579_v40  ;;  %v712_v44 = vadd.f32 %v711_v42, %v647_v41 }
 0x1a3   : > { %875 = vmatmul.f32.gmra.mxu3 %v1096_v43 }
 0x1a4   : > { %1099 = vtanh.f32 %v712_v44 }
 0x1a5   : > { %v516_v45 = vpop.f32.mrf.mxu2 }
 0x1a6   : > { %v517_v46 = vadd.f32 %v516_v45, %v1504_v29  ;;  %v581_v47 = vpop.f32.mrf.mxu3 }
 0x1a7   : > { %v649_v48 = vpop.f32.mrf.mxu0 }
 0x1a8   : > { %v1098_v49 = vpop.eup %1097  ;;  %v582_v50 = vadd.f32 %v581_v47, %v517_v46  ;;  %v650_v51 = vadd.f32 %v649_v48, %v1501_v53  ;;  %v714_v52 = vpop.f32.mrf.mxu1 }
 0x1a9   : > { %810 = vmatmul.f32.gmra.mxu2 %v1098_v49 }
 0x1aa   : > { %v1100_v55 = vpop.eup %1099  ;;  %1101 = vtanh.f32 %v582_v50  ;;  %v715_v56 = vadd.f32 %v714_v52, %v650_v51 }
 0x1ab   : > { %878 = vmatmul.f32.gmra.mxu3 %v1100_v55 }
 0x1ac   : > { %1103 = vtanh.f32 %v715_v56 }
 0x1ad   : > { %v519_v57 = vpop.f32.mrf.mxu2 }
 0x1ae   : > { %v520_v58 = vadd.f32 %v519_v57, %v1504_v29  ;;  %v584_v59 = vpop.f32.mrf.mxu3 }
 0x1b0   : > { %v1102_v60 = vpop.eup %1101  ;;  %v585_v61 = vadd.f32 %v584_v59, %v520_v58 }
 0x1b1   : > { %813 = vmatmul.f32.gmra.mxu2 %v1102_v60 }
 0x1b2   : > { %v1104_v62 = vpop.eup %1103  ;;  %1105 = vtanh.f32 %v585_v61 }
 0x1b3   : > { %881 = vmatmul.f32.gmra.mxu3 %v1104_v62 }
 0x1b8   : > { %v1106_v53 = vpop.eup %1105 }
 0x1b9   : > { %816 = vmatmul.f32.gmra.mxu2 %v1106_v53 }
 0x1be   : > { %v837_v63 = vpop.f32.mrf.mxu3 }
 0x1c4   : > { %v772_v29 = vpop.f32.mrf.mxu2 }
 0x1c5   : > { %v838_v0 = vadd.f32 %v837_v63, %v772_v29 }
 0x1c6   : > { %v840_v1 = vpop.f32.mrf.mxu3 }
 0x1c7   : > { %886 = vst.msk [vmem:[%s1542_s15] sm:$0xff] %vm885_vm0, %v838_v0 }
 0x1cc   : > { %v775_v2 = vpop.f32.mrf.mxu2 }
 0x1cd   : > { %v841_v3 = vadd.f32 %v840_v1, %v775_v2 }
 0x1ce   : > { %v843_v4 = vpop.f32.mrf.mxu3 }
 0x1cf   : > { %887 = vst.msk [vmem:[%s1542_s15 + $0x8] sm:$0xff] %vm885_vm0, %v841_v3 }
 0x1d4   : > { %v778_v5 = vpop.f32.mrf.mxu2 }
 0x1d5   : > { %v844_v6 = vadd.f32 %v843_v4, %v778_v5 }
 0x1d6   : > { %v846_v7 = vpop.f32.mrf.mxu3 }
 0x1d7   : > { %888 = vst.msk [vmem:[%s1542_s15 + $0x10] sm:$0xff] %vm885_vm0, %v844_v6 }
 0x1dc   : > { %v781_v8 = vpop.f32.mrf.mxu2 }
 0x1dd   : > { %v847_v9 = vadd.f32 %v846_v7, %v781_v8 }
 0x1de   : > { %v849_v10 = vpop.f32.mrf.mxu3 }
 0x1df   : > { %889 = vst.msk [vmem:[%s1542_s15 + $0x18] sm:$0xff] %vm885_vm0, %v847_v9 }
 0x1e4   : > { %v784_v11 = vpop.f32.mrf.mxu2 }
 0x1e5   : > { %v850_v12 = vadd.f32 %v849_v10, %v784_v11 }
 0x1e6   : > { %v852_v13 = vpop.f32.mrf.mxu3 }
 0x1e7   : > { %890 = vst.msk [vmem:[%s1542_s15 + $0x20] sm:$0xff] %vm885_vm0, %v850_v12 }
 0x1ec   : > { %v787_v14 = vpop.f32.mrf.mxu2 }
 0x1ed   : > { %v853_v15 = vadd.f32 %v852_v13, %v787_v14 }
 0x1ee   : > { %v855_v16 = vpop.f32.mrf.mxu3 }
 0x1ef   : > { %891 = vst.msk [vmem:[%s1542_s15 + $0x28] sm:$0xff] %vm885_vm0, %v853_v15 }
 0x1f4   : > { %v790_v17 = vpop.f32.mrf.mxu2 }
 0x1f5   : > { %v856_v18 = vadd.f32 %v855_v16, %v790_v17 }
 0x1f6   : > { %v858_v19 = vpop.f32.mrf.mxu3 }
 0x1f7   : > { %892 = vst.msk [vmem:[%s1542_s15 + $0x30] sm:$0xff] %vm885_vm0, %v856_v18 }
 0x1fc   : > { %v793_v20 = vpop.f32.mrf.mxu2 }
 0x1fd   : > { %v859_v21 = vadd.f32 %v858_v19, %v793_v20 }
 0x1fe   : > { %v861_v22 = vpop.f32.mrf.mxu3 }
 0x1ff   : > { %893 = vst.msk [vmem:[%s1542_s15 + $0x38] sm:$0xff] %vm885_vm0, %v859_v21 }
 0x204   : > { %v796_v23 = vpop.f32.mrf.mxu2 }
 0x205   : > { %v862_v24 = vadd.f32 %v861_v22, %v796_v23 }
 0x206   : > { %v864_v25 = vpop.f32.mrf.mxu3 }
 0x207   : > { %894 = vst.msk [vmem:[%s1542_s15 + $0x40] sm:$0xff] %vm885_vm0, %v862_v24 }
 0x20c   : > { %v799_v54 = vpop.f32.mrf.mxu2 }
 0x20d   : > { %v865_v26 = vadd.f32 %v864_v25, %v799_v54 }
 0x20e   : > { %v867_v27 = vpop.f32.mrf.mxu3 }
 0x20f   : > { %895 = vst.msk [vmem:[%s1542_s15 + $0x48] sm:$0xff] %vm885_vm0, %v865_v26 }
 0x214   : > { %v802_v28 = vpop.f32.mrf.mxu2 }
 0x215   : > { %v868_v30 = vadd.f32 %v867_v27, %v802_v28 }
 0x216   : > { %v870_v31 = vpop.f32.mrf.mxu3 }
 0x217   : > { %896 = vst.msk [vmem:[%s1542_s15 + $0x50] sm:$0xff] %vm885_vm0, %v868_v30 }
 0x21c   : > { %v805_v32 = vpop.f32.mrf.mxu2 }
 0x21d   : > { %v871_v33 = vadd.f32 %v870_v31, %v805_v32 }
 0x21e   : > { %v873_v34 = vpop.f32.mrf.mxu3 }
 0x21f   : > { %897 = vst.msk [vmem:[%s1542_s15 + $0x58] sm:$0xff] %vm885_vm0, %v871_v33 }
 0x224   : > { %v808_v35 = vpop.f32.mrf.mxu2 }
 0x225   : > { %v874_v36 = vadd.f32 %v873_v34, %v808_v35 }
 0x226   : > { %v876_v37 = vpop.f32.mrf.mxu3 }
 0x227   : > { %898 = vst.msk [vmem:[%s1542_s15 + $0x60] sm:$0xff] %vm885_vm0, %v874_v36 }
 0x22c   : > { %v811_v38 = vpop.f32.mrf.mxu2 }
 0x22d   : > { %v877_v39 = vadd.f32 %v876_v37, %v811_v38 }
 0x22e   : > { %v879_v40 = vpop.f32.mrf.mxu3 }
 0x22f   : > { %899 = vst.msk [vmem:[%s1542_s15 + $0x68] sm:$0xff] %vm885_vm0, %v877_v39 }
 0x234   : > { %v814_v41 = vpop.f32.mrf.mxu2 }
 0x235   : > { %v880_v42 = vadd.f32 %v879_v40, %v814_v41 }
 0x236   : > { %v882_v43 = vpop.f32.mrf.mxu3 }
 0x237   : > { %900 = vst.msk [vmem:[%s1542_s15 + $0x70] sm:$0xff] %vm885_vm0, %v880_v42 }
 0x23c   : > { %v817_v44 = vpop.f32.mrf.mxu2 }
 0x23d   : > { %v883_v45 = vadd.f32 %v882_v43, %v817_v44 }
 0x23f   : > { %901 = vst.msk [vmem:[%s1542_s15 + $0x78] sm:$0xff] %vm885_vm0, %v883_v45 }
 0x240 PF: > { %s12_s9 = sadd.s32 1, %s1113_s9  }
 0x241   : > { %p9_p5 = scmp.ge.s32.totalorder %s12_s9, 5  }
 0x243   :  { %11 = sbr.rel (!%p9_p5) target bundleno = 1 (0x1), region = 60 }

// kernel: _valuenet_pallas.3
= control target key start
LH: loop header
LB: loop body
LE: loop exit
PB: predicated region body
PF: predicated region fallthrough
CT: control target
= control target key end

     0   :  { %vm439_vm0 = vcmask 31744   ;;  %vm445_vm1 = vcmask 24576   ;;  %s889_s1 = inlined_call_operand.vmem [shape: f32[392,256], index: 1, kind: input, shape index: {}]   ;;  %s890_s0 = inlined_call_operand.vmem [shape: f32[41,128], index: 0, kind: input, shape index: {}]   ;;  %s891_s2 = inlined_call_operand.vmem [shape: f32[41,4], index: 2, kind: output, shape index: {}]  }
   0x1   :  { %v47_v0 = vld [vmem:[%s889_s1 + $0xf0] sm:$0xff]  ;;  %v45_v1 = vld [vmem:[%s889_s1 + $0xe0] sm:$0xff]  ;;  %v48_v2 = vld [vmem:[%s889_s1 + $0xf8] sm:$0xff] }
   0x2   :  { %124 = vmatpush.msra.mxu0 %v47_v0  ;;  %159 = vmatpush.msra.mxu1 %v48_v2  ;;  %v46_v3 = vld [vmem:[%s889_s1 + $0xe8] sm:$0xff]  ;;  %v43_v4 = vld [vmem:[%s889_s1 + $0xd0] sm:$0xff]  ;;  %v44_v5 = vld [vmem:[%s889_s1 + $0xd8] sm:$0xff] }
   0x3   :  { %v41_v6 = vld [vmem:[%s889_s1 + $0xc0] sm:$0xff]  ;;  %v42_v7 = vld [vmem:[%s889_s1 + $0xc8] sm:$0xff]  ;;  %v39_v8 = vld [vmem:[%s889_s1 + $0xb0] sm:$0xff] }
   0x4   :  { %125 = vmatpush.msra.mxu0 %v45_v1  ;;  %160 = vmatpush.msra.mxu1 %v46_v3  ;;  %v40_v9 = vld [vmem:[%s889_s1 + $0xb8] sm:$0xff]  ;;  %v37_v10 = vld [vmem:[%s889_s1 + $0xa0] sm:$0xff]  ;;  %v38_v11 = vld [vmem:[%s889_s1 + $0xa8] sm:$0xff] }
   0x5   :  { %v35_v12 = vld [vmem:[%s889_s1 + $0x90] sm:$0xff]  ;;  %v36_v13 = vld [vmem:[%s889_s1 + $0x98] sm:$0xff]  ;;  %v33_v14 = vld [vmem:[%s889_s1 + $0x80] sm:$0xff] }
   0x6   :  { %126 = vmatpush.msra.mxu0 %v43_v4  ;;  %161 = vmatpush.msra.mxu1 %v44_v5  ;;  %v34_v15 = vld [vmem:[%s889_s1 + $0x88] sm:$0xff]  ;;  %v31_v16 = vld [vmem:[%s889_s1 + $0x70] sm:$0xff]  ;;  %v32_v17 = vld [vmem:[%s889_s1 + $0x78] sm:$0xff] }
   0x7   :  { %v29_v18 = vld [vmem:[%s889_s1 + $0x60] sm:$0xff]  ;;  %v30_v19 = vld [vmem:[%s889_s1 + $0x68] sm:$0xff]  ;;  %v27_v20 = vld [vmem:[%s889_s1 + $0x50] sm:$0xff] }
   0x8   :  { %127 = vmatpush.msra.mxu0 %v41_v6  ;;  %162 = vmatpush.msra.mxu1 %v42_v7  ;;  %v28_v21 = vld [vmem:[%s889_s1 + $0x58] sm:$0xff]  ;;  %v25_v22 = vld [vmem:[%s889_s1 + $0x40] sm:$0xff]  ;;  %v26_v23 = vld [vmem:[%s889_s1 + $0x48] sm:$0xff] }
   0x9   :  { %v23_v24 = vld [vmem:[%s889_s1 + $0x30] sm:$0xff]  ;;  %v24_v25 = vld [vmem:[%s889_s1 + $0x38] sm:$0xff]  ;;  %v21_v26 = vld [vmem:[%s889_s1 + $0x20] sm:$0xff] }
   0xa   :  { %128 = vmatpush.msra.mxu0 %v39_v8  ;;  %163 = vmatpush.msra.mxu1 %v40_v9  ;;  %v22_v27 = vld [vmem:[%s889_s1 + $0x28] sm:$0xff]  ;;  %v19_v28 = vld [vmem:[%s889_s1 + $0x10] sm:$0xff]  ;;  %v20_v29 = vld [vmem:[%s889_s1 + $0x18] sm:$0xff] }
   0xb   :  { %v17_v30 = vld [vmem:[%s889_s1] sm:$0xff]  ;;  %v18_v31 = vld [vmem:[%s889_s1 + $0x8] sm:$0xff]  ;;  %v80_v34 = vld [vmem:[%s889_s1 + $0x1f8] sm:$0xff] }
   0xc   :  { %129 = vmatpush.msra.mxu0 %v37_v10  ;;  %164 = vmatpush.msra.mxu1 %v38_v11  ;;  %v11_v32 = vld [vmem:[%s890_s0] sm:$0xff]  ;;  %v12_v33 = vld [vmem:[%s890_s0 + $0x8] sm:$0xff]  ;;  %v112_v35 = vld [vmem:[%s889_s1 + $0x2f8] sm:$0xff] }
   0xd   :  { %v78_v36 = vld [vmem:[%s889_s1 + $0x1e8] sm:$0xff]  ;;  %v76_v38 = vld [vmem:[%s889_s1 + $0x1d8] sm:$0xff]  ;;  %v79_v40 = vld [vmem:[%s889_s1 + $0x1f0] sm:$0xff] }
   0xe   :  { %130 = vmatpush.msra.mxu0 %v35_v12  ;;  %165 = vmatpush.msra.mxu1 %v36_v13  ;;  %v110_v37 = vld [vmem:[%s889_s1 + $0x2e8] sm:$0xff]  ;;  %v108_v39 = vld [vmem:[%s889_s1 + $0x2d8] sm:$0xff]  ;;  %v77_v41 = vld [vmem:[%s889_s1 + $0x1e0] sm:$0xff] }
   0xf   :  { %v111_v42 = vld [vmem:[%s889_s1 + $0x2f0] sm:$0xff]  ;;  %v74_v43 = vld [vmem:[%s889_s1 + $0x1c8] sm:$0xff]  ;;  %211 = vmatpush.msra.mxu2 %v79_v40  ;;  %v109_v45 = vld [vmem:[%s889_s1 + $0x2e0] sm:$0xff] }
  0x10   :  { %131 = vmatpush.msra.mxu0 %v33_v14  ;;  %166 = vmatpush.msra.mxu1 %v34_v15  ;;  %v106_v44 = vld [vmem:[%s889_s1 + $0x2c8] sm:$0xff]  ;;  %v13_v46 = vld [vmem:[%s890_s0 + $0x10] sm:$0xff]  ;;  %v72_v47 = vld [vmem:[%s889_s1 + $0x1b8] sm:$0xff] }
  0x11   :  { %246 = vmatpush.msra.mxu3 %v111_v42  ;;  %212 = vmatpush.msra.mxu2 %v77_v41  ;;  %v104_v48 = vld [vmem:[%s889_s1 + $0x2b8] sm:$0xff]  ;;  %v75_v49 = vld [vmem:[%s889_s1 + $0x1d0] sm:$0xff]  ;;  %v70_v51 = vld [vmem:[%s889_s1 + $0x1a8] sm:$0xff] }
  0x12   :  { %132 = vmatpush.msra.mxu0 %v31_v16  ;;  %167 = vmatpush.msra.mxu1 %v32_v17  ;;  %v107_v50 = vld [vmem:[%s889_s1 + $0x2d0] sm:$0xff]  ;;  %v102_v52 = vld [vmem:[%s889_s1 + $0x2a8] sm:$0xff]  ;;  %v73_v53 = vld [vmem:[%s889_s1 + $0x1c0] sm:$0xff] }
  0x13   :  { %247 = vmatpush.msra.mxu3 %v109_v45  ;;  %v105_v54 = vld [vmem:[%s889_s1 + $0x2c0] sm:$0xff]  ;;  %213 = vmatpush.msra.mxu2 %v75_v49  ;;  %v68_v55 = vld [vmem:[%s889_s1 + $0x198] sm:$0xff]  ;;  %v71_v57 = vld [vmem:[%s889_s1 + $0x1b0] sm:$0xff] }
  0x14   :  { %133 = vmatpush.msra.mxu0 %v29_v18  ;;  %168 = vmatpush.msra.mxu1 %v30_v19  ;;  %v100_v56 = vld [vmem:[%s889_s1 + $0x298] sm:$0xff]  ;;  %v103_v58 = vld [vmem:[%s889_s1 + $0x2b0] sm:$0xff]  ;;  %v66_v59 = vld [vmem:[%s889_s1 + $0x188] sm:$0xff] }
  0x15   :  { %248 = vmatpush.msra.mxu3 %v107_v50  ;;  %214 = vmatpush.msra.mxu2 %v73_v53  ;;  %v98_v60 = vld [vmem:[%s889_s1 + $0x288] sm:$0xff]  ;;  %v14_v61 = vld [vmem:[%s890_s0 + $0x18] sm:$0xff]  ;;  %v69_v62 = vld [vmem:[%s889_s1 + $0x1a0] sm:$0xff] }
  0x16   :  { %134 = vmatpush.msra.mxu0 %v27_v20  ;;  %169 = vmatpush.msra.mxu1 %v28_v21  ;;  %v101_v63 = vld [vmem:[%s889_s1 + $0x2a0] sm:$0xff]  ;;  %v64_v0 = vld [vmem:[%s889_s1 + $0x178] sm:$0xff]  ;;  %v67_v2 = vld [vmem:[%s889_s1 + $0x190] sm:$0xff] }
  0x17   :  { %249 = vmatpush.msra.mxu3 %v105_v54  ;;  %215 = vmatpush.msra.mxu2 %v71_v57  ;;  %v96_v1 = vld [vmem:[%s889_s1 + $0x278] sm:$0xff]  ;;  %v99_v3 = vld [vmem:[%s889_s1 + $0x290] sm:$0xff]  ;;  %v62_v4 = vld [vmem:[%s889_s1 + $0x168] sm:$0xff] }
  0x18   :  { %135 = vmatpush.msra.mxu0 %v25_v22  ;;  %170 = vmatpush.msra.mxu1 %v26_v23  ;;  %v94_v5 = vld [vmem:[%s889_s1 + $0x268] sm:$0xff]  ;;  %v65_v6 = vld [vmem:[%s889_s1 + $0x180] sm:$0xff]  ;;  %v60_v8 = vld [vmem:[%s889_s1 + $0x158] sm:$0xff] }
  0x19   :  { %250 = vmatpush.msra.mxu3 %v103_v58  ;;  %216 = vmatpush.msra.mxu2 %v69_v62  ;;  %v97_v7 = vld [vmem:[%s889_s1 + $0x280] sm:$0xff]  ;;  %v63_v9 = vld [vmem:[%s889_s1 + $0x170] sm:$0xff]  ;;  %v16_v15 = vld [vmem:[%s890_s0 + $0x28] sm:$0x1] }
  0x1a   :  { %136 = vmatpush.msra.mxu0 %v23_v24  ;;  %171 = vmatpush.msra.mxu1 %v24_v25  ;;  %v95_v10 = vld [vmem:[%s889_s1 + $0x270] sm:$0xff]  ;;  %v15_v11 = vld [vmem:[%s890_s0 + $0x20] sm:$0xff]  ;;  %v92_v16 = vld [vmem:[%s889_s1 + $0x258] sm:$0xff] }
  0x1b   :  { %251 = vmatpush.msra.mxu3 %v101_v63  ;;  %217 = vmatpush.msra.mxu2 %v67_v2  ;;  %v61_v12 = vld [vmem:[%s889_s1 + $0x160] sm:$0xff]  ;;  %v59_v14 = vld [vmem:[%s889_s1 + $0x150] sm:$0xff]  ;;  %v58_v19 = vld [vmem:[%s889_s1 + $0x148] sm:$0xff] }
  0x1c   :  { %137 = vmatpush.msra.mxu0 %v21_v26  ;;  %172 = vmatpush.msra.mxu1 %v22_v27  ;;  %v93_v13 = vld [vmem:[%s889_s1 + $0x260] sm:$0xff]  ;;  %v91_v18 = vld [vmem:[%s889_s1 + $0x250] sm:$0xff]  ;;  %v56_v22 = vld [vmem:[%s889_s1 + $0x138] sm:$0xff] }
  0x1d   :  { %252 = vmatpush.msra.mxu3 %v99_v3  ;;  %218 = vmatpush.msra.mxu2 %v65_v6  ;;  %v57_v17 = vld [vmem:[%s889_s1 + $0x140] sm:$0xff]  ;;  %v55_v20 = vld [vmem:[%s889_s1 + $0x130] sm:$0xff]  ;;  %v90_v23 = vld [vmem:[%s889_s1 + $0x248] sm:$0xff] }
  0x1e   :  { %138 = vmatpush.msra.mxu0 %v19_v28  ;;  %173 = vmatpush.msra.mxu1 %v20_v29  ;;  %v89_v21 = vld [vmem:[%s889_s1 + $0x240] sm:$0xff]  ;;  %v87_v25 = vld [vmem:[%s889_s1 + $0x230] sm:$0xff]  ;;  %v54_v26 = vld [vmem:[%s889_s1 + $0x128] sm:$0xff] }
  0x1f   :  { %253 = vmatpush.msra.mxu3 %v97_v7  ;;  %219 = vmatpush.msra.mxu2 %v63_v9  ;;  %v53_v24 = vld [vmem:[%s889_s1 + $0x120] sm:$0xff]  ;;  %v88_v27 = vld [vmem:[%s889_s1 + $0x238] sm:$0xff]  ;;  %v51_v28 = vld [vmem:[%s889_s1 + $0x110] sm:$0xff] }
  0x20   :  { %139 = vmatpush.msra.mxu0 %v17_v30  ;;  %174 = vmatpush.msra.mxu1 %v18_v31  ;;  %v85_v29 = vld [vmem:[%s889_s1 + $0x220] sm:$0xff]  ;;  %v52_v30 = vld [vmem:[%s889_s1 + $0x118] sm:$0xff]  ;;  %v86_v31 = vld [vmem:[%s889_s1 + $0x228] sm:$0xff] }
  0x21   :  { %140 = vmatmul.f32.vlgmr.msra.gmra.mxu0 %v11_v32  ;;  %175 = vmatmul.f32.vlgmr.msra.gmra.mxu1 %v11_v32  ;;  %v49_v32 = vld [vmem:[%s889_s1 + $0x100] sm:$0xff]  ;;  %v118_v58 = vld [vmem:[%s889_s1 + $0x308] sm:$0x3c] }
  0x22   :  { %281 = vmatpush.msrb.mxu0 %v80_v34  ;;  %316 = vmatpush.msrb.mxu1 %v112_v35  ;;  %v50_v34 = vld [vmem:[%s889_s1 + $0x108] sm:$0xff]  ;;  %v84_v35 = vld [vmem:[%s889_s1 + $0x218] sm:$0xff]  ;;  %v117_v57 = vld [vmem:[%s889_s1 + $0x300] sm:$0x3c] }
  0x23   :  { %254 = vmatpush.msra.mxu3 %v95_v10  ;;  %220 = vmatpush.msra.mxu2 %v61_v12 }
  0x24   :  { %282 = vmatpush.msrb.mxu0 %v78_v36  ;;  %317 = vmatpush.msrb.mxu1 %v110_v37  ;;  %v81_v36 = vld [vmem:[%s889_s1 + $0x200] sm:$0xff]  ;;  %v82_v37 = vld [vmem:[%s889_s1 + $0x208] sm:$0xff] }
  0x25   :  { %255 = vmatpush.msra.mxu3 %v93_v13  ;;  %221 = vmatpush.msra.mxu2 %v59_v14 }
  0x26   :  { %283 = vmatpush.msrb.mxu0 %v76_v38  ;;  %318 = vmatpush.msrb.mxu1 %v108_v39  ;;  %v451_v38 = vld [vmem:[%s889_s1 + $0x300] ss:$8 sm:$0x3] }
  0x27   :  { %222 = vmatpush.msra.mxu2 %v57_v17  ;;  %256 = vmatpush.msra.mxu3 %v91_v18  ;;  %v825_v39 = vperm.slane %v451_v38, 0  ;;  %v827_v40 = vperm.slane %v451_v38, 1  ;;  %v452_v17 = vld [vmem:[%s889_s1 + $0x301] ss:$8 sm:$0x3] }
  0x28   :  { %284 = vmatpush.msrb.mxu0 %v74_v43  ;;  %319 = vmatpush.msrb.mxu1 %v106_v44  ;;  %v850_v18 = vperm.slane %v452_v17, 1 }
  0x29   :  { %143 = vmatmul.f32.gmra.mxu0 %v12_v33  ;;  %178 = vmatmul.f32.gmra.mxu1 %v12_v33  ;;  %v83_v33 = vld [vmem:[%s889_s1 + $0x210] sm:$0xff] }
  0x2a   :  { %285 = vmatpush.msrb.mxu0 %v72_v47  ;;  %320 = vmatpush.msrb.mxu1 %v104_v48 }
  0x2b   :  { %223 = vmatpush.msra.mxu2 %v55_v20  ;;  %257 = vmatpush.msra.mxu3 %v89_v21 }
  0x2c   :  { %286 = vmatpush.msrb.mxu0 %v70_v51  ;;  %321 = vmatpush.msrb.mxu1 %v102_v52 }
  0x2d   :  { %224 = vmatpush.msra.mxu2 %v53_v24  ;;  %258 = vmatpush.msra.mxu3 %v87_v25 }
  0x2e   :  { %287 = vmatpush.msrb.mxu0 %v68_v55  ;;  %322 = vmatpush.msrb.mxu1 %v100_v56 }
  0x2f   :  { %225 = vmatpush.msra.mxu2 %v51_v28  ;;  %259 = vmatpush.msra.mxu3 %v85_v29 }
  0x30   :  { %288 = vmatpush.msrb.mxu0 %v66_v59  ;;  %323 = vmatpush.msrb.mxu1 %v98_v60  ;;  %v365_v59 = vrot.slane %v117_v57, 2  ;;  %v366_v60 = vrot.slane %v118_v58, 2 }
  0x31   :  { %146 = vmatmul.f32.gmra.mxu0 %v13_v46  ;;  %181 = vmatmul.f32.gmra.mxu1 %v13_v46 }
  0x32   :  { %289 = vmatpush.msrb.mxu0 %v64_v0  ;;  %324 = vmatpush.msrb.mxu1 %v96_v1 }
  0x33   :  { %226 = vmatpush.msra.mxu2 %v49_v32  ;;  %260 = vmatpush.msra.mxu3 %v83_v33 }
  0x34   :  { %290 = vmatpush.msrb.mxu0 %v62_v4  ;;  %325 = vmatpush.msrb.mxu1 %v94_v5 }
  0x35   :  { %261 = vmatpush.msra.mxu3 %v81_v36  ;;  %384 = vmatpush.xpose.msrb.mxu2 %v365_v59 }
  0x36   :  { %291 = vmatpush.msrb.mxu0 %v60_v8  ;;  %326 = vmatpush.msrb.mxu1 %v92_v16 }
  0x37   :  { %419 = vmatpush.xpose.msrb.mxu3 %v366_v60 }
  0x38   :  { %292 = vmatpush.msrb.mxu0 %v58_v19  ;;  %327 = vmatpush.msrb.mxu1 %v90_v23  ;;  %v853_v23 = vperm.slane %v452_v17, 0 }
  0x39   :  { %149 = vmatmul.f32.gmra.mxu0 %v14_v61  ;;  %184 = vmatmul.f32.gmra.mxu1 %v14_v61 }
  0x3a   :  { %293 = vmatpush.msrb.mxu0 %v56_v22  ;;  %328 = vmatpush.msrb.mxu1 %v88_v27 }
  0x3c   :  { %294 = vmatpush.msrb.mxu0 %v54_v26  ;;  %329 = vmatpush.msrb.mxu1 %v86_v31 }
  0x3e   :  { %295 = vmatpush.msrb.mxu0 %v52_v30  ;;  %330 = vmatpush.msrb.mxu1 %v84_v35 }
  0x40   :  { %296 = vmatpush.msrb.mxu0 %v50_v34  ;;  %331 = vmatpush.msrb.mxu1 %v82_v37 }
  0x41   :  { %152 = vmatmul.f32.gmra.mxu0 %v15_v11  ;;  %187 = vmatmul.f32.gmra.mxu1 %v15_v11 }
  0x49   :  { %155 = vmatmul.f32.gmra.mxu0 %v16_v15  ;;  %190 = vmatmul.f32.gmra.mxu1 %v16_v15 }
  0x9e   :  { %v141_v41 = vpop.f32.mrf.mxu0  ;;  %v176_v42 = vpop.f32.mrf.mxu1 }
  0x9f   :  { %v142_v43 = vadd.f32 %v141_v41, %v825_v39  ;;  %v177_v44 = vadd.f32 %v176_v42, %v827_v40 }
  0xa1   :  { %453 = vtanh.f32 %v142_v43 }
  0xa2   :  { %455 = vtanh.f32 %v177_v44 }
  0xa6   :  { %v144_v45 = vpop.f32.mrf.mxu0  ;;  %v179_v46 = vpop.f32.mrf.mxu1 }
  0xa7   :  { %v454_v47 = vpop.eup %453  ;;  %v145_v48 = vadd.f32 %v144_v45, %v825_v39  ;;  %v180_v49 = vadd.f32 %v179_v46, %v827_v40 }
  0xa8   :  { %v456_v50 = vpop.eup %455  ;;  %227 = vmatmul.f32.vlgmr.msra.gmra.mxu2 %v454_v47  ;;  %297 = vmatmul.f32.vlgmr.msrb.gmra.mxu0 %v454_v47 }
  0xa9   :  { %457 = vtanh.f32 %v145_v48  ;;  %262 = vmatmul.f32.vlgmr.msra.gmra.mxu3 %v456_v50  ;;  %332 = vmatmul.f32.vlgmr.msrb.gmra.mxu1 %v456_v50 }
  0xaa   :  { %459 = vtanh.f32 %v180_v49 }
  0xae   :  { %v147_v51 = vpop.f32.mrf.mxu0  ;;  %v182_v52 = vpop.f32.mrf.mxu1 }
  0xaf   :  { %v458_v53 = vpop.eup %457  ;;  %v148_v54 = vadd.f32 %v147_v51, %v825_v39  ;;  %v183_v55 = vadd.f32 %v182_v52, %v827_v40 }
  0xb0   :  { %v460_v56 = vpop.eup %459  ;;  %230 = vmatmul.f32.gmra.mxu2 %v458_v53  ;;  %300 = vmatmul.f32.gmra.mxu0 %v458_v53 }
  0xb1   :  { %461 = vtanh.f32 %v148_v54  ;;  %265 = vmatmul.f32.gmra.mxu3 %v460_v56  ;;  %335 = vmatmul.f32.gmra.mxu1 %v460_v56 }
  0xb2   :  { %463 = vtanh.f32 %v183_v55 }
  0xb6   :  { %v150_v61 = vpop.f32.mrf.mxu0  ;;  %v185_v62 = vpop.f32.mrf.mxu1 }
  0xb7   :  { %v462_v63 = vpop.eup %461  ;;  %v151_v0 = vadd.f32 %v150_v61, %v825_v39  ;;  %v186_v1 = vadd.f32 %v185_v62, %v827_v40 }
  0xb8   :  { %v464_v2 = vpop.eup %463  ;;  %233 = vmatmul.f32.gmra.mxu2 %v462_v63  ;;  %303 = vmatmul.f32.gmra.mxu0 %v462_v63 }
  0xb9   :  { %465 = vtanh.f32 %v151_v0  ;;  %268 = vmatmul.f32.gmra.mxu3 %v464_v2  ;;  %338 = vmatmul.f32.gmra.mxu1 %v464_v2 }
  0xba   :  { %467 = vtanh.f32 %v186_v1 }
  0xbe   :  { %v153_v3 = vpop.f32.mrf.mxu0  ;;  %v188_v4 = vpop.f32.mrf.mxu1 }
  0xbf   :  { %v466_v5 = vpop.eup %465  ;;  %v154_v6 = vadd.f32 %v153_v3, %v825_v39  ;;  %v189_v7 = vadd.f32 %v188_v4, %v827_v40 }
  0xc0   :  { %v468_v8 = vpop.eup %467  ;;  %236 = vmatmul.f32.gmra.mxu2 %v466_v5  ;;  %306 = vmatmul.f32.gmra.mxu0 %v466_v5 }
  0xc1   :  { %469 = vtanh.f32 %v154_v6  ;;  %271 = vmatmul.f32.gmra.mxu3 %v468_v8  ;;  %341 = vmatmul.f32.gmra.mxu1 %v468_v8 }
  0xc2   :  { %471 = vtanh.f32 %v189_v7 }
  0xc6   :  { %v156_v9 = vpop.f32.mrf.mxu0  ;;  %v191_v10 = vpop.f32.mrf.mxu1 }
  0xc7   :  { %v470_v11 = vpop.eup %469  ;;  %v157_v12 = vadd.f32 %v156_v9, %v825_v39  ;;  %v192_v13 = vadd.f32 %v191_v10, %v827_v40 }
  0xc8   :  { %v472_v14 = vpop.eup %471  ;;  %239 = vmatmul.f32.gmra.mxu2 %v470_v11  ;;  %309 = vmatmul.f32.gmra.mxu0 %v470_v11 }
  0xc9   :  { %473 = vtanh.f32 %v157_v12  ;;  %274 = vmatmul.f32.gmra.mxu3 %v472_v14  ;;  %344 = vmatmul.f32.gmra.mxu1 %v472_v14 }
  0xca   :  { %475 = vtanh.f32 %v192_v13 }
  0xcf   :  { %v474_v15 = vpop.eup %473 }
  0xd0   :  { %v476_v16 = vpop.eup %475  ;;  %242 = vmatmul.f32.gmra.mxu2 %v474_v15  ;;  %312 = vmatmul.f32.gmra.mxu0 %v474_v15 }
  0xd1   :  { %277 = vmatmul.f32.gmra.mxu3 %v476_v16  ;;  %347 = vmatmul.f32.gmra.mxu1 %v476_v16 }
 0x125   :  { %v298_v19 = vpop.f32.mrf.mxu0 }
 0x126   :  { %v299_v20 = vadd.f32 %v298_v19, %v850_v18  ;;  %v333_v21 = vpop.f32.mrf.mxu1 }
 0x128   :  { %v334_v22 = vadd.f32 %v333_v21, %v299_v20 }
 0x12a   :  { %477 = vtanh.f32 %v334_v22 }
 0x12b   :  { %v228_v24 = vpop.f32.mrf.mxu2 }
 0x12c   :  { %v229_v25 = vadd.f32 %v228_v24, %v853_v23  ;;  %v263_v26 = vpop.f32.mrf.mxu3 }
 0x12d   :  { %v301_v27 = vpop.f32.mrf.mxu0 }
 0x12e   :  { %v264_v28 = vadd.f32 %v263_v26, %v229_v25  ;;  %v302_v29 = vadd.f32 %v301_v27, %v850_v18  ;;  %v336_v30 = vpop.f32.mrf.mxu1 }
 0x130   :  { %v478_v31 = vpop.eup %477  ;;  %479 = vtanh.f32 %v264_v28  ;;  %v337_v32 = vadd.f32 %v336_v30, %v302_v29 }
 0x131   :  { %420 = vmatmul.f32.vlgmr.msrb.gmra.mxu3 %v478_v31 }
 0x132   :  { %481 = vtanh.f32 %v337_v32 }
 0x133   :  { %v231_v33 = vpop.f32.mrf.mxu2 }
 0x134   :  { %v232_v34 = vadd.f32 %v231_v33, %v853_v23  ;;  %v266_v35 = vpop.f32.mrf.mxu3 }
 0x135   :  { %v304_v36 = vpop.f32.mrf.mxu0 }
 0x136   :  { %v480_v37 = vpop.eup %479  ;;  %v267_v38 = vadd.f32 %v266_v35, %v232_v34  ;;  %v305_v39 = vadd.f32 %v304_v36, %v850_v18  ;;  %v339_v40 = vpop.f32.mrf.mxu1 }
 0x137   :  { %385 = vmatmul.f32.vlgmr.msrb.gmra.mxu2 %v480_v37 }
 0x138   :  { %v482_v41 = vpop.eup %481  ;;  %483 = vtanh.f32 %v267_v38  ;;  %v340_v42 = vadd.f32 %v339_v40, %v305_v39 }
 0x139   :  { %423 = vmatmul.f32.gmra.mxu3 %v482_v41 }
 0x13a   :  { %485 = vtanh.f32 %v340_v42 }
 0x13b   :  { %v234_v43 = vpop.f32.mrf.mxu2 }
 0x13c   :  { %v235_v44 = vadd.f32 %v234_v43, %v853_v23  ;;  %v269_v45 = vpop.f32.mrf.mxu3 }
 0x13d   :  { %v307_v46 = vpop.f32.mrf.mxu0 }
 0x13e   :  { %v484_v47 = vpop.eup %483  ;;  %v270_v48 = vadd.f32 %v269_v45, %v235_v44  ;;  %v308_v49 = vadd.f32 %v307_v46, %v850_v18  ;;  %v342_v50 = vpop.f32.mrf.mxu1 }
 0x13f   :  { %388 = vmatmul.f32.gmra.mxu2 %v484_v47 }
 0x140   :  { %v486_v51 = vpop.eup %485  ;;  %487 = vtanh.f32 %v270_v48  ;;  %v343_v52 = vadd.f32 %v342_v50, %v308_v49 }
 0x141   :  { %426 = vmatmul.f32.gmra.mxu3 %v486_v51 }
 0x142   :  { %489 = vtanh.f32 %v343_v52 }
 0x143   :  { %v237_v53 = vpop.f32.mrf.mxu2 }
 0x144   :  { %v238_v54 = vadd.f32 %v237_v53, %v853_v23  ;;  %v272_v55 = vpop.f32.mrf.mxu3 }
 0x145   :  { %v310_v56 = vpop.f32.mrf.mxu0 }
 0x146   :  { %v488_v57 = vpop.eup %487  ;;  %v273_v58 = vadd.f32 %v272_v55, %v238_v54  ;;  %v311_v59 = vadd.f32 %v310_v56, %v850_v18  ;;  %v345_v60 = vpop.f32.mrf.mxu1 }
 0x147   :  { %391 = vmatmul.f32.gmra.mxu2 %v488_v57 }
 0x148   :  { %v490_v61 = vpop.eup %489  ;;  %491 = vtanh.f32 %v273_v58  ;;  %v346_v62 = vadd.f32 %v345_v60, %v311_v59 }
 0x149   :  { %429 = vmatmul.f32.gmra.mxu3 %v490_v61 }
 0x14a   :  { %493 = vtanh.f32 %v346_v62 }
 0x14b   :  { %v240_v63 = vpop.f32.mrf.mxu2 }
 0x14c   :  { %v241_v0 = vadd.f32 %v240_v63, %v853_v23  ;;  %v275_v1 = vpop.f32.mrf.mxu3 }
 0x14d   :  { %v313_v2 = vpop.f32.mrf.mxu0 }
 0x14e   :  { %v492_v3 = vpop.eup %491  ;;  %v276_v4 = vadd.f32 %v275_v1, %v241_v0  ;;  %v314_v5 = vadd.f32 %v313_v2, %v850_v18  ;;  %v348_v6 = vpop.f32.mrf.mxu1 }
 0x14f   :  { %394 = vmatmul.f32.gmra.mxu2 %v492_v3 }
 0x150   :  { %v494_v7 = vpop.eup %493  ;;  %495 = vtanh.f32 %v276_v4  ;;  %v349_v8 = vadd.f32 %v348_v6, %v314_v5 }
 0x151   :  { %432 = vmatmul.f32.gmra.mxu3 %v494_v7 }
 0x152   :  { %497 = vtanh.f32 %v349_v8 }
 0x153   :  { %v243_v9 = vpop.f32.mrf.mxu2 }
 0x154   :  { %v244_v10 = vadd.f32 %v243_v9, %v853_v23  ;;  %v278_v11 = vpop.f32.mrf.mxu3 }
 0x156   :  { %v496_v12 = vpop.eup %495  ;;  %v279_v13 = vadd.f32 %v278_v11, %v244_v10 }
 0x157   :  { %397 = vmatmul.f32.gmra.mxu2 %v496_v12 }
 0x158   :  { %v498_v14 = vpop.eup %497  ;;  %499 = vtanh.f32 %v279_v13 }
 0x159   :  { %435 = vmatmul.f32.gmra.mxu3 %v498_v14 }
 0x15e   :  { %v500_v15 = vpop.eup %499 }
 0x15f   :  { %400 = vmatmul.f32.gmra.mxu2 %v500_v15 }
 0x1b4   :  { %v421_v16 = vpop.f32.mrf.mxu3 }
 0x1ba   :  { %v386_v17 = vpop.f32.mrf.mxu2 }
 0x1bb   :  { %v422_v18 = vadd.f32 %v421_v16, %v386_v17 }
 0x1bc   :  { %v424_v19 = vpop.f32.mrf.mxu3 }
 0x1bd   :  { %440 = vst.msk [vmem:[%s891_s2] sm:$0xff] %vm439_vm0, %v422_v18 }
 0x1c2   :  { %v389_v20 = vpop.f32.mrf.mxu2 }
 0x1c3   :  { %v425_v21 = vadd.f32 %v424_v19, %v389_v20 }
 0x1c4   :  { %v427_v22 = vpop.f32.mrf.mxu3 }
 0x1c5   :  { %441 = vst.msk [vmem:[%s891_s2 + $0x8] sm:$0xff] %vm439_vm0, %v425_v21 }
 0x1ca   :  { %v392_v23 = vpop.f32.mrf.mxu2 }
 0x1cb   :  { %v428_v24 = vadd.f32 %v427_v22, %v392_v23 }
 0x1cc   :  { %v430_v25 = vpop.f32.mrf.mxu3 }
 0x1cd   :  { %442 = vst.msk [vmem:[%s891_s2 + $0x10] sm:$0xff] %vm439_vm0, %v428_v24 }
 0x1d2   :  { %v395_v26 = vpop.f32.mrf.mxu2 }
 0x1d3   :  { %v431_v27 = vadd.f32 %v430_v25, %v395_v26 }
 0x1d4   :  { %v433_v28 = vpop.f32.mrf.mxu3 }
 0x1d5   :  { %443 = vst.msk [vmem:[%s891_s2 + $0x18] sm:$0xff] %vm439_vm0, %v431_v27 }
 0x1da   :  { %v398_v29 = vpop.f32.mrf.mxu2 }
 0x1db   :  { %v434_v30 = vadd.f32 %v433_v28, %v398_v29 }
 0x1dc   :  { %v436_v31 = vpop.f32.mrf.mxu3 }
 0x1dd   :  { %444 = vst.msk [vmem:[%s891_s2 + $0x20] sm:$0xff] %vm439_vm0, %v434_v30 }
 0x1e2   :  { %v401_v32 = vpop.f32.mrf.mxu2 }
 0x1e3   :  { %v437_v33 = vadd.f32 %v436_v31, %v401_v32 }
 0x1e5   :  { %446 = vst.msk [vmem:[%s891_s2 + $0x28] sm:$0x1] %vm445_vm1, %v437_v33 }

</bundles_post_ra>
